<compile_context>
chip_gen: v6e
topology: v6e:2x2x1
jax: 0.10.0
libtpu: 0.0.40
codegen_flags: <defaults>
</compile_context>

<pallas_src>
import jax
import jax.numpy as jnp
import numpy as np
from jax.experimental import pallas as pl
from jax.experimental.pallas import tpu as pltpu


_VMEM_SPEC = pl.BlockSpec(memory_space=pltpu.MemorySpace.VMEM)


# ---------------------------------------------------------------------------
# Fused Pallas kernel (all layers + event-add + fc head)
# ---------------------------------------------------------------------------

def make_fused_kernel(num_layers, input_size, hidden_size, T, B):
    """Fused multi-layer LSTM + event-add + fc head.

    Ref layout (positional):
      x_ref    : (T*B, Din)            bf16  time-major rows (row = t*B + b)
      e_ref    : (B, H)                f32   event embedding of the LAST step
      w_fc_ref : (H, O)                bf16
      b_fc_ref : (1, O)                f32
      w_ih_ref : (Din + (L-1)*H, 4H)   bf16  per-layer input weights, concat
      w_hh_ref : (L, H, 4H)            bf16  recurrent weights, stacked
      b_ref    : (L, 1, 4H)            f32   fused b_ih + b_hh, stacked
      out_ref  : (B, O)                f32
    """
    H = hidden_size

    def kernel(x_ref, e_ref, w_fc_ref, b_fc_ref, w_ih_ref, w_hh_ref, b_ref,
               out_ref):
        # Layer-0 input: time-major flattened rows, bf16 for the MXU.
        inp = x_ref[...]                                   # (T*B, Din)
        din = input_size
        off = 0
        h = None

        for l in range(num_layers):
            is_last = l == num_layers - 1
            w_ih = w_ih_ref[pl.ds(off, din), :]            # (Din_l, 4H) bf16
            w_hh = w_hh_ref[l]                             # (H, 4H)     bf16
            b = b_ref[l]                                   # (1, 4H)     f32

            # Hoisted input projection: ONE big MXU matmul over all T*B rows,
            # bias folded in.  Kept as an SSA value (a couple of vregs at
            # these shapes) and sliced with static indices below.
            gx = jnp.dot(inp, w_ih,
                         preferred_element_type=jnp.float32) + b  # (T*B, 4H)

            h = jnp.zeros((B, H), jnp.float32)
            c = jnp.zeros((B, H), jnp.float32)
            h_b = None
            hs = []

            # Short fixed T -> static Python loop (fully inlined) so gx can be
            # sliced with compile-time indices; only h_b @ w_hh is left on the
            # serial critical path.
            for t in range(T):
                if t == 0:
                    gates = gx[0:B, :]        # h0 == 0 exactly -> skip 0 @ w_hh
                else:
                    gates = gx[t * B:(t + 1) * B, :] + jnp.dot(
                        h_b, w_hh, preferred_element_type=jnp.float32)
                sig = jax.nn.sigmoid(gates)                # i,f,o in one pass
                i = sig[:, 0 * H:1 * H]
                f = sig[:, 1 * H:2 * H]
                o = sig[:, 3 * H:4 * H]
                g = jnp.tanh(gates[:, 2 * H:3 * H])
                c = f * c + i * g
                h = o * jnp.tanh(c)
                h_b = h.astype(jnp.bfloat16)  # reused: next step + inter-layer seq
                if not is_last:
                    hs.append(h_b)

            if not is_last:
                # Inter-layer sequence stays in vregs, already bf16 / 2D —
                # feeds the next layer's big projection directly.
                inp = jnp.concatenate(hs, axis=0)          # (T*B, H) bf16
                off += din
                din = H

        # Head: (h_T + event_embed_T) @ W_fc^T + b_fc, bf16 MXU in / f32 acc.
        fused = (h + e_ref[...]).astype(jnp.bfloat16)
        out_ref[...] = (
            jnp.dot(fused, w_fc_ref[...], preferred_element_type=jnp.float32)
            + b_fc_ref[...]
        )

    return kernel


# ---------------------------------------------------------------------------
# Wrapper
# ---------------------------------------------------------------------------

def prepare_params(params):
    """One-time layout prep: transpose, fuse biases, pack layers, bf16 MXU inputs."""
    lstm = params["lstm"]
    return {
        "num_layers": len(lstm),
        "hidden_size": lstm[0]["w_hh"].shape[1],
        # Per-layer input weights concatenated along Din (layer 0 is (D,4H),
        # later layers (H,4H)); sliced by static offsets inside the kernel.
        "w_ih_cat": jnp.concatenate(
            [jnp.transpose(l["w_ih"]) for l in lstm], axis=0
        ).astype(jnp.bfloat16),
        "w_hh_stack": jnp.stack(
            [jnp.transpose(l["w_hh"]) for l in lstm], axis=0
        ).astype(jnp.bfloat16),
        "b_stack": jnp.stack(
            [(l["b_ih"] + l["b_hh"]).reshape(1, -1) for l in lstm], axis=0
        ).astype(jnp.float32),
        "w_fc_t": jnp.transpose(params["w_fc"]).astype(jnp.bfloat16),   # (H, O)
        "b_fc": params["b_fc"].reshape(1, -1).astype(jnp.float32),      # (1, O)
        "embed": params["embed"].astype(jnp.float32),                   # (10, H)
    }


def event_driven_lstm_forward(x, events, prep):
    """x: (B, T, D) f32, events: (B, T) int32 in [0, 10) -> (B, O) f32."""
    B, T, D = x.shape
    num_layers = prep["num_layers"]
    H = prep["hidden_size"]
    O = prep["w_fc_t"].shape[1]

    # Time-major flattened rows (row t*B + b) so the kernel's hoisted
    # projection needs no in-kernel transpose; bf16 MXU inputs.
    x_2d = jnp.transpose(x, (1, 0, 2)).reshape(T * B, D).astype(jnp.bfloat16)
    # Embedding gather of the last event: tiny XLA glue outside the kernel.
    e_last = jnp.take(prep["embed"], events[:, -1], axis=0)             # (B, H)

    args = [x_2d, e_last, prep["w_fc_t"], prep["b_fc"],
            prep["w_ih_cat"], prep["w_hh_stack"], prep["b_stack"]]

    return pl.pallas_call(
        make_fused_kernel(num_layers, D, H, T, B),
        out_shape=jax.ShapeDtypeStruct((B, O), jnp.float32),
        in_specs=[_VMEM_SPEC] * len(args),
        out_specs=_VMEM_SPEC,
        compiler_params=pltpu.CompilerParams(
            vmem_limit_bytes=32 * 1024 * 1024,   # v5e scoped default is 16 MiB
        ),
    )(*args)


# ---------------------------------------------------------------------------
# Deterministic parameter init (PyTorch LSTM/Linear style uniform(-k, k))
# ---------------------------------------------------------------------------

def init_params(key, input_size, hidden_size, num_layers, output_size):
    k = 1.0 / np.sqrt(hidden_size)
    params = {"lstm": []}
    for layer in range(num_layers):
        din = input_size if layer == 0 else hidden_size
        key, k1, k2, k3, k4 = jax.random.split(key, 5)
        params["lstm"].append({
            "w_ih": jax.random.uniform(k1, (4 * hidden_size, din), jnp.float32, -k, k),
            "w_hh": jax.random.uniform(k2, (4 * hidden_size, hidden_size), jnp.float32, -k, k),
            "b_ih": jax.random.uniform(k3, (4 * hidden_size,), jnp.float32, -k, k),
            "b_hh": jax.random.uniform(k4, (4 * hidden_size,), jnp.float32, -k, k),
        })
    key, k5, k6, k7 = jax.random.split(key, 4)
    params["w_fc"] = jax.random.uniform(k5, (output_size, hidden_size), jnp.float32, -k, k)
    params["b_fc"] = jax.random.uniform(k6, (output_size,), jnp.float32, -k, k)
    params["embed"] = jax.random.normal(k7, (10, hidden_size), jnp.float32)
    return params


# ---------------------------------------------------------------------------
# Pure-JAX f32 reference (mirrors the PyTorch forward, no dropout)
# ---------------------------------------------------------------------------

def reference_forward(x, events, params):
    B, T, _ = x.shape
    h_seq = x
    for layer in params["lstm"]:
        H = layer["w_hh"].shape[1]
        h = jnp.zeros((B, H), jnp.float32)
        c = jnp.zeros((B, H), jnp.float32)
        outs = []
        for t in range(T):
            gates = (h_seq[:, t, :] @ layer["w_ih"].T + h @ layer["w_hh"].T
                     + layer["b_ih"] + layer["b_hh"])
            i = jax.nn.sigmoid(gates[:, 0 * H:1 * H])
            f = jax.nn.sigmoid(gates[:, 1 * H:2 * H])
            g = jnp.tanh(gates[:, 2 * H:3 * H])
            o = jax.nn.sigmoid(gates[:, 3 * H:4 * H])
            c = f * c + i * g
            h = o * jnp.tanh(c)
            outs.append(h)
        h_seq = jnp.stack(outs, axis=1)
    e_last = jnp.take(params["embed"], events[:, -1], axis=0)
    return (h_seq[:, -1, :] + e_last) @ params["w_fc"].T + params["b_fc"]


if __name__ == "__main__":
    B, T = 2, 8
    input_size, hidden_size, num_layers, output_size = 16, 32, 2, 4

    key = jax.random.PRNGKey(0)
    key, kx, ke, kp = jax.random.split(key, 4)
    x = jax.random.normal(kx, (B, T, input_size), jnp.float32)
    events = jax.random.randint(ke, (B, T), 0, 10, jnp.int32)
    params = init_params(kp, input_size, hidden_size, num_layers, output_size)
    prep = prepare_params(params)

    out = event_driven_lstm_forward(x, events, prep)
    out = jax.block_until_ready(out)

    ref = reference_forward(x, events, params)
    assert out.shape == (B, output_size)
    assert np.allclose(np.asarray(out), np.asarray(ref), atol=1e-2, rtol=1e-2)

    print("KERNEL_OK")
</pallas_src>

<mosaic_0001>
module attributes {stable_mosaic.version = 11 : i64} {
  func.func @kernel(%arg0: memref<16x16xbf16, #tpu.memory_space<vmem>>, %arg1: memref<2x32xf32, #tpu.memory_space<vmem>>, %arg2: memref<32x4xbf16, #tpu.memory_space<vmem>>, %arg3: memref<1x4xf32, #tpu.memory_space<vmem>>, %arg4: memref<48x128xbf16, #tpu.memory_space<vmem>>, %arg5: memref<2x32x128xbf16, #tpu.memory_space<vmem>>, %arg6: memref<2x1x128xf32, #tpu.memory_space<vmem>>, %arg7: memref<2x4xf32, #tpu.memory_space<vmem>>) attributes {dimension_semantics = [], scalar_prefetch = 0 : i64, scratch_operands = 0 : i64, tpu.core_type = #tpu.core_type<tc>} {
    %c0 = arith.constant 0 : index
    %c0_0 = arith.constant 0 : index
    %0 = vector.load %arg0[%c0, %c0_0] : memref<16x16xbf16, #tpu.memory_space<vmem>>, vector<16x16xbf16>
    %c0_1 = arith.constant 0 : index
    %c0_2 = arith.constant 0 : index
    %1 = vector.load %arg4[%c0_1, %c0_2] : memref<48x128xbf16, #tpu.memory_space<vmem>>, vector<16x128xbf16>
    %c0_3 = arith.constant 0 : index
    %c0_4 = arith.constant 0 : index
    %c0_5 = arith.constant 0 : index
    %2 = vector.load %arg5[%c0_3, %c0_4, %c0_5] : memref<2x32x128xbf16, #tpu.memory_space<vmem>>, vector<1x32x128xbf16>
    %3 = vector.shape_cast %2 : vector<1x32x128xbf16> to vector<32x128xbf16>
    %c0_6 = arith.constant 0 : index
    %c0_7 = arith.constant 0 : index
    %c0_8 = arith.constant 0 : index
    %4 = vector.load %arg6[%c0_6, %c0_7, %c0_8] : memref<2x1x128xf32, #tpu.memory_space<vmem>>, vector<1x1x128xf32>
    %5 = vector.shape_cast %4 : vector<1x1x128xf32> to vector<1x128xf32>
    %cst = arith.constant dense<0.000000e+00> : vector<16x128xf32>
    %6 = tpu.matmul %0, %1, %cst {dimension_numbers = #tpu.dot_dimension_numbers<[1], [0], [0], [1], [0, 0, 1, 1], [], []>} : vector<16x16xbf16>, vector<16x128xbf16>, vector<16x128xf32> -> vector<16x128xf32>
    %7 = vector.broadcast %5 : vector<1x128xf32> to vector<16x128xf32>
    %8 = arith.addf %6, %7 : vector<16x128xf32>
    %cst_9 = arith.constant 0.000000e+00 : f32
    %9 = vector.broadcast %cst_9 : f32 to vector<2x32xf32>
    %10 = vector.extract_strided_slice %8 {offsets = [0, 0], sizes = [2, 128], strides = [1, 1]} : vector<16x128xf32> to vector<2x128xf32>
    %11 = arith.negf %10 : vector<2x128xf32>
    %12 = math.exp %11 : vector<2x128xf32>
    %cst_10 = arith.constant 1.000000e+00 : f32
    %13 = vector.broadcast %cst_10 : f32 to vector<2x128xf32>
    %14 = arith.addf %13, %12 : vector<2x128xf32>
    %15 = arith.divf %13, %14 : vector<2x128xf32>
    %16 = vector.extract_strided_slice %15 {offsets = [0, 0], sizes = [2, 32], strides = [1, 1]} : vector<2x128xf32> to vector<2x32xf32>
    %17 = vector.extract_strided_slice %15 {offsets = [0, 32], sizes = [2, 32], strides = [1, 1]} : vector<2x128xf32> to vector<2x32xf32>
    %18 = vector.extract_strided_slice %15 {offsets = [0, 96], sizes = [2, 32], strides = [1, 1]} : vector<2x128xf32> to vector<2x32xf32>
    %19 = vector.extract_strided_slice %10 {offsets = [0, 64], sizes = [2, 32], strides = [1, 1]} : vector<2x128xf32> to vector<2x32xf32>
    %20 = math.tanh %19 : vector<2x32xf32>
    %21 = arith.mulf %17, %9 : vector<2x32xf32>
    %22 = arith.mulf %16, %20 : vector<2x32xf32>
    %23 = arith.addf %21, %22 : vector<2x32xf32>
    %24 = math.tanh %23 : vector<2x32xf32>
    %25 = arith.mulf %18, %24 : vector<2x32xf32>
    %26 = arith.truncf %25 : vector<2x32xf32> to vector<2x32xbf16>
    %27 = vector.extract_strided_slice %8 {offsets = [2, 0], sizes = [2, 128], strides = [1, 1]} : vector<16x128xf32> to vector<2x128xf32>
    %cst_11 = arith.constant dense<0.000000e+00> : vector<2x128xf32>
    %28 = tpu.matmul %26, %3, %cst_11 {dimension_numbers = #tpu.dot_dimension_numbers<[1], [0], [0], [1], [0, 0, 1, 1], [], []>} : vector<2x32xbf16>, vector<32x128xbf16>, vector<2x128xf32> -> vector<2x128xf32>
    %29 = arith.addf %27, %28 : vector<2x128xf32>
    %30 = arith.negf %29 : vector<2x128xf32>
    %31 = math.exp %30 : vector<2x128xf32>
    %cst_12 = arith.constant 1.000000e+00 : f32
    %32 = vector.broadcast %cst_12 : f32 to vector<2x128xf32>
    %33 = arith.addf %32, %31 : vector<2x128xf32>
    %34 = arith.divf %32, %33 : vector<2x128xf32>
    %35 = vector.extract_strided_slice %34 {offsets = [0, 0], sizes = [2, 32], strides = [1, 1]} : vector<2x128xf32> to vector<2x32xf32>
    %36 = vector.extract_strided_slice %34 {offsets = [0, 32], sizes = [2, 32], strides = [1, 1]} : vector<2x128xf32> to vector<2x32xf32>
    %37 = vector.extract_strided_slice %34 {offsets = [0, 96], sizes = [2, 32], strides = [1, 1]} : vector<2x128xf32> to vector<2x32xf32>
    %38 = vector.extract_strided_slice %29 {offsets = [0, 64], sizes = [2, 32], strides = [1, 1]} : vector<2x128xf32> to vector<2x32xf32>
    %39 = math.tanh %38 : vector<2x32xf32>
    %40 = arith.mulf %36, %23 : vector<2x32xf32>
    %41 = arith.mulf %35, %39 : vector<2x32xf32>
    %42 = arith.addf %40, %41 : vector<2x32xf32>
    %43 = math.tanh %42 : vector<2x32xf32>
    %44 = arith.mulf %37, %43 : vector<2x32xf32>
    %45 = arith.truncf %44 : vector<2x32xf32> to vector<2x32xbf16>
    %46 = vector.extract_strided_slice %8 {offsets = [4, 0], sizes = [2, 128], strides = [1, 1]} : vector<16x128xf32> to vector<2x128xf32>
    %cst_13 = arith.constant dense<0.000000e+00> : vector<2x128xf32>
    %47 = tpu.matmul %45, %3, %cst_13 {dimension_numbers = #tpu.dot_dimension_numbers<[1], [0], [0], [1], [0, 0, 1, 1], [], []>} : vector<2x32xbf16>, vector<32x128xbf16>, vector<2x128xf32> -> vector<2x128xf32>
    %48 = arith.addf %46, %47 : vector<2x128xf32>
    %49 = arith.negf %48 : vector<2x128xf32>
    %50 = math.exp %49 : vector<2x128xf32>
    %cst_14 = arith.constant 1.000000e+00 : f32
    %51 = vector.broadcast %cst_14 : f32 to vector<2x128xf32>
    %52 = arith.addf %51, %50 : vector<2x128xf32>
    %53 = arith.divf %51, %52 : vector<2x128xf32>
    %54 = vector.extract_strided_slice %53 {offsets = [0, 0], sizes = [2, 32], strides = [1, 1]} : vector<2x128xf32> to vector<2x32xf32>
    %55 = vector.extract_strided_slice %53 {offsets = [0, 32], sizes = [2, 32], strides = [1, 1]} : vector<2x128xf32> to vector<2x32xf32>
    %56 = vector.extract_strided_slice %53 {offsets = [0, 96], sizes = [2, 32], strides = [1, 1]} : vector<2x128xf32> to vector<2x32xf32>
    %57 = vector.extract_strided_slice %48 {offsets = [0, 64], sizes = [2, 32], strides = [1, 1]} : vector<2x128xf32> to vector<2x32xf32>
    %58 = math.tanh %57 : vector<2x32xf32>
    %59 = arith.mulf %55, %42 : vector<2x32xf32>
    %60 = arith.mulf %54, %58 : vector<2x32xf32>
    %61 = arith.addf %59, %60 : vector<2x32xf32>
    %62 = math.tanh %61 : vector<2x32xf32>
    %63 = arith.mulf %56, %62 : vector<2x32xf32>
    %64 = arith.truncf %63 : vector<2x32xf32> to vector<2x32xbf16>
    %65 = vector.extract_strided_slice %8 {offsets = [6, 0], sizes = [2, 128], strides = [1, 1]} : vector<16x128xf32> to vector<2x128xf32>
    %cst_15 = arith.constant dense<0.000000e+00> : vector<2x128xf32>
    %66 = tpu.matmul %64, %3, %cst_15 {dimension_numbers = #tpu.dot_dimension_numbers<[1], [0], [0], [1], [0, 0, 1, 1], [], []>} : vector<2x32xbf16>, vector<32x128xbf16>, vector<2x128xf32> -> vector<2x128xf32>
    %67 = arith.addf %65, %66 : vector<2x128xf32>
    %68 = arith.negf %67 : vector<2x128xf32>
    %69 = math.exp %68 : vector<2x128xf32>
    %cst_16 = arith.constant 1.000000e+00 : f32
    %70 = vector.broadcast %cst_16 : f32 to vector<2x128xf32>
    %71 = arith.addf %70, %69 : vector<2x128xf32>
    %72 = arith.divf %70, %71 : vector<2x128xf32>
    %73 = vector.extract_strided_slice %72 {offsets = [0, 0], sizes = [2, 32], strides = [1, 1]} : vector<2x128xf32> to vector<2x32xf32>
    %74 = vector.extract_strided_slice %72 {offsets = [0, 32], sizes = [2, 32], strides = [1, 1]} : vector<2x128xf32> to vector<2x32xf32>
    %75 = vector.extract_strided_slice %72 {offsets = [0, 96], sizes = [2, 32], strides = [1, 1]} : vector<2x128xf32> to vector<2x32xf32>
    %76 = vector.extract_strided_slice %67 {offsets = [0, 64], sizes = [2, 32], strides = [1, 1]} : vector<2x128xf32> to vector<2x32xf32>
    %77 = math.tanh %76 : vector<2x32xf32>
    %78 = arith.mulf %74, %61 : vector<2x32xf32>
    %79 = arith.mulf %73, %77 : vector<2x32xf32>
    %80 = arith.addf %78, %79 : vector<2x32xf32>
    %81 = math.tanh %80 : vector<2x32xf32>
    %82 = arith.mulf %75, %81 : vector<2x32xf32>
    %83 = arith.truncf %82 : vector<2x32xf32> to vector<2x32xbf16>
    %84 = vector.extract_strided_slice %8 {offsets = [8, 0], sizes = [2, 128], strides = [1, 1]} : vector<16x128xf32> to vector<2x128xf32>
    %cst_17 = arith.constant dense<0.000000e+00> : vector<2x128xf32>
    %85 = tpu.matmul %83, %3, %cst_17 {dimension_numbers = #tpu.dot_dimension_numbers<[1], [0], [0], [1], [0, 0, 1, 1], [], []>} : vector<2x32xbf16>, vector<32x128xbf16>, vector<2x128xf32> -> vector<2x128xf32>
    %86 = arith.addf %84, %85 : vector<2x128xf32>
    %87 = arith.negf %86 : vector<2x128xf32>
    %88 = math.exp %87 : vector<2x128xf32>
    %cst_18 = arith.constant 1.000000e+00 : f32
    %89 = vector.broadcast %cst_18 : f32 to vector<2x128xf32>
    %90 = arith.addf %89, %88 : vector<2x128xf32>
    %91 = arith.divf %89, %90 : vector<2x128xf32>
    %92 = vector.extract_strided_slice %91 {offsets = [0, 0], sizes = [2, 32], strides = [1, 1]} : vector<2x128xf32> to vector<2x32xf32>
    %93 = vector.extract_strided_slice %91 {offsets = [0, 32], sizes = [2, 32], strides = [1, 1]} : vector<2x128xf32> to vector<2x32xf32>
    %94 = vector.extract_strided_slice %91 {offsets = [0, 96], sizes = [2, 32], strides = [1, 1]} : vector<2x128xf32> to vector<2x32xf32>
    %95 = vector.extract_strided_slice %86 {offsets = [0, 64], sizes = [2, 32], strides = [1, 1]} : vector<2x128xf32> to vector<2x32xf32>
    %96 = math.tanh %95 : vector<2x32xf32>
    %97 = arith.mulf %93, %80 : vector<2x32xf32>
    %98 = arith.mulf %92, %96 : vector<2x32xf32>
    %99 = arith.addf %97, %98 : vector<2x32xf32>
    %100 = math.tanh %99 : vector<2x32xf32>
    %101 = arith.mulf %94, %100 : vector<2x32xf32>
    %102 = arith.truncf %101 : vector<2x32xf32> to vector<2x32xbf16>
    %103 = vector.extract_strided_slice %8 {offsets = [10, 0], sizes = [2, 128], strides = [1, 1]} : vector<16x128xf32> to vector<2x128xf32>
    %cst_19 = arith.constant dense<0.000000e+00> : vector<2x128xf32>
    %104 = tpu.matmul %102, %3, %cst_19 {dimension_numbers = #tpu.dot_dimension_numbers<[1], [0], [0], [1], [0, 0, 1, 1], [], []>} : vector<2x32xbf16>, vector<32x128xbf16>, vector<2x128xf32> -> vector<2x128xf32>
    %105 = arith.addf %103, %104 : vector<2x128xf32>
    %106 = arith.negf %105 : vector<2x128xf32>
    %107 = math.exp %106 : vector<2x128xf32>
    %cst_20 = arith.constant 1.000000e+00 : f32
    %108 = vector.broadcast %cst_20 : f32 to vector<2x128xf32>
    %109 = arith.addf %108, %107 : vector<2x128xf32>
    %110 = arith.divf %108, %109 : vector<2x128xf32>
    %111 = vector.extract_strided_slice %110 {offsets = [0, 0], sizes = [2, 32], strides = [1, 1]} : vector<2x128xf32> to vector<2x32xf32>
    %112 = vector.extract_strided_slice %110 {offsets = [0, 32], sizes = [2, 32], strides = [1, 1]} : vector<2x128xf32> to vector<2x32xf32>
    %113 = vector.extract_strided_slice %110 {offsets = [0, 96], sizes = [2, 32], strides = [1, 1]} : vector<2x128xf32> to vector<2x32xf32>
    %114 = vector.extract_strided_slice %105 {offsets = [0, 64], sizes = [2, 32], strides = [1, 1]} : vector<2x128xf32> to vector<2x32xf32>
    %115 = math.tanh %114 : vector<2x32xf32>
    %116 = arith.mulf %112, %99 : vector<2x32xf32>
    %117 = arith.mulf %111, %115 : vector<2x32xf32>
    %118 = arith.addf %116, %117 : vector<2x32xf32>
    %119 = math.tanh %118 : vector<2x32xf32>
    %120 = arith.mulf %113, %119 : vector<2x32xf32>
    %121 = arith.truncf %120 : vector<2x32xf32> to vector<2x32xbf16>
    %122 = vector.extract_strided_slice %8 {offsets = [12, 0], sizes = [2, 128], strides = [1, 1]} : vector<16x128xf32> to vector<2x128xf32>
    %cst_21 = arith.constant dense<0.000000e+00> : vector<2x128xf32>
    %123 = tpu.matmul %121, %3, %cst_21 {dimension_numbers = #tpu.dot_dimension_numbers<[1], [0], [0], [1], [0, 0, 1, 1], [], []>} : vector<2x32xbf16>, vector<32x128xbf16>, vector<2x128xf32> -> vector<2x128xf32>
    %124 = arith.addf %122, %123 : vector<2x128xf32>
    %125 = arith.negf %124 : vector<2x128xf32>
    %126 = math.exp %125 : vector<2x128xf32>
    %cst_22 = arith.constant 1.000000e+00 : f32
    %127 = vector.broadcast %cst_22 : f32 to vector<2x128xf32>
    %128 = arith.addf %127, %126 : vector<2x128xf32>
    %129 = arith.divf %127, %128 : vector<2x128xf32>
    %130 = vector.extract_strided_slice %129 {offsets = [0, 0], sizes = [2, 32], strides = [1, 1]} : vector<2x128xf32> to vector<2x32xf32>
    %131 = vector.extract_strided_slice %129 {offsets = [0, 32], sizes = [2, 32], strides = [1, 1]} : vector<2x128xf32> to vector<2x32xf32>
    %132 = vector.extract_strided_slice %129 {offsets = [0, 96], sizes = [2, 32], strides = [1, 1]} : vector<2x128xf32> to vector<2x32xf32>
    %133 = vector.extract_strided_slice %124 {offsets = [0, 64], sizes = [2, 32], strides = [1, 1]} : vector<2x128xf32> to vector<2x32xf32>
    %134 = math.tanh %133 : vector<2x32xf32>
    %135 = arith.mulf %131, %118 : vector<2x32xf32>
    %136 = arith.mulf %130, %134 : vector<2x32xf32>
    %137 = arith.addf %135, %136 : vector<2x32xf32>
    %138 = math.tanh %137 : vector<2x32xf32>
    %139 = arith.mulf %132, %138 : vector<2x32xf32>
    %140 = arith.truncf %139 : vector<2x32xf32> to vector<2x32xbf16>
    %141 = vector.extract_strided_slice %8 {offsets = [14, 0], sizes = [2, 128], strides = [1, 1]} : vector<16x128xf32> to vector<2x128xf32>
    %cst_23 = arith.constant dense<0.000000e+00> : vector<2x128xf32>
    %142 = tpu.matmul %140, %3, %cst_23 {dimension_numbers = #tpu.dot_dimension_numbers<[1], [0], [0], [1], [0, 0, 1, 1], [], []>} : vector<2x32xbf16>, vector<32x128xbf16>, vector<2x128xf32> -> vector<2x128xf32>
    %143 = arith.addf %141, %142 : vector<2x128xf32>
    %144 = arith.negf %143 : vector<2x128xf32>
    %145 = math.exp %144 : vector<2x128xf32>
    %cst_24 = arith.constant 1.000000e+00 : f32
    %146 = vector.broadcast %cst_24 : f32 to vector<2x128xf32>
    %147 = arith.addf %146, %145 : vector<2x128xf32>
    %148 = arith.divf %146, %147 : vector<2x128xf32>
    %149 = vector.extract_strided_slice %148 {offsets = [0, 0], sizes = [2, 32], strides = [1, 1]} : vector<2x128xf32> to vector<2x32xf32>
    %150 = vector.extract_strided_slice %148 {offsets = [0, 32], sizes = [2, 32], strides = [1, 1]} : vector<2x128xf32> to vector<2x32xf32>
    %151 = vector.extract_strided_slice %148 {offsets = [0, 96], sizes = [2, 32], strides = [1, 1]} : vector<2x128xf32> to vector<2x32xf32>
    %152 = vector.extract_strided_slice %143 {offsets = [0, 64], sizes = [2, 32], strides = [1, 1]} : vector<2x128xf32> to vector<2x32xf32>
    %153 = math.tanh %152 : vector<2x32xf32>
    %154 = arith.mulf %150, %137 : vector<2x32xf32>
    %155 = arith.mulf %149, %153 : vector<2x32xf32>
    %156 = arith.addf %154, %155 : vector<2x32xf32>
    %157 = math.tanh %156 : vector<2x32xf32>
    %158 = arith.mulf %151, %157 : vector<2x32xf32>
    %159 = arith.truncf %158 : vector<2x32xf32> to vector<2x32xbf16>
    %160 = tpu.concatenate %26, %45, %64, %83, %102, %121, %140, %159 in 0 : vector<2x32xbf16>, vector<2x32xbf16>, vector<2x32xbf16>, vector<2x32xbf16>, vector<2x32xbf16>, vector<2x32xbf16>, vector<2x32xbf16>, vector<2x32xbf16> -> vector<16x32xbf16>
    %c16 = arith.constant 16 : index
    %c0_25 = arith.constant 0 : index
    %161 = vector.load %arg4[%c16, %c0_25] : memref<48x128xbf16, #tpu.memory_space<vmem>>, vector<32x128xbf16>
    %c1 = arith.constant 1 : index
    %c0_26 = arith.constant 0 : index
    %c0_27 = arith.constant 0 : index
    %162 = vector.load %arg5[%c1, %c0_26, %c0_27] : memref<2x32x128xbf16, #tpu.memory_space<vmem>>, vector<1x32x128xbf16>
    %163 = vector.shape_cast %162 : vector<1x32x128xbf16> to vector<32x128xbf16>
    %c1_28 = arith.constant 1 : index
    %c0_29 = arith.constant 0 : index
    %c0_30 = arith.constant 0 : index
    %164 = vector.load %arg6[%c1_28, %c0_29, %c0_30] : memref<2x1x128xf32, #tpu.memory_space<vmem>>, vector<1x1x128xf32>
    %165 = vector.shape_cast %164 : vector<1x1x128xf32> to vector<1x128xf32>
    %cst_31 = arith.constant dense<0.000000e+00> : vector<16x128xf32>
    %166 = tpu.matmul %160, %161, %cst_31 {dimension_numbers = #tpu.dot_dimension_numbers<[1], [0], [0], [1], [0, 0, 1, 1], [], []>} : vector<16x32xbf16>, vector<32x128xbf16>, vector<16x128xf32> -> vector<16x128xf32>
    %167 = vector.broadcast %165 : vector<1x128xf32> to vector<16x128xf32>
    %168 = arith.addf %166, %167 : vector<16x128xf32>
    %cst_32 = arith.constant 0.000000e+00 : f32
    %169 = vector.broadcast %cst_32 : f32 to vector<2x32xf32>
    %170 = vector.extract_strided_slice %168 {offsets = [0, 0], sizes = [2, 128], strides = [1, 1]} : vector<16x128xf32> to vector<2x128xf32>
    %171 = arith.negf %170 : vector<2x128xf32>
    %172 = math.exp %171 : vector<2x128xf32>
    %cst_33 = arith.constant 1.000000e+00 : f32
    %173 = vector.broadcast %cst_33 : f32 to vector<2x128xf32>
    %174 = arith.addf %173, %172 : vector<2x128xf32>
    %175 = arith.divf %173, %174 : vector<2x128xf32>
    %176 = vector.extract_strided_slice %175 {offsets = [0, 0], sizes = [2, 32], strides = [1, 1]} : vector<2x128xf32> to vector<2x32xf32>
    %177 = vector.extract_strided_slice %175 {offsets = [0, 32], sizes = [2, 32], strides = [1, 1]} : vector<2x128xf32> to vector<2x32xf32>
    %178 = vector.extract_strided_slice %175 {offsets = [0, 96], sizes = [2, 32], strides = [1, 1]} : vector<2x128xf32> to vector<2x32xf32>
    %179 = vector.extract_strided_slice %170 {offsets = [0, 64], sizes = [2, 32], strides = [1, 1]} : vector<2x128xf32> to vector<2x32xf32>
    %180 = math.tanh %179 : vector<2x32xf32>
    %181 = arith.mulf %177, %169 : vector<2x32xf32>
    %182 = arith.mulf %176, %180 : vector<2x32xf32>
    %183 = arith.addf %181, %182 : vector<2x32xf32>
    %184 = math.tanh %183 : vector<2x32xf32>
    %185 = arith.mulf %178, %184 : vector<2x32xf32>
    %186 = arith.truncf %185 : vector<2x32xf32> to vector<2x32xbf16>
    %187 = vector.extract_strided_slice %168 {offsets = [2, 0], sizes = [2, 128], strides = [1, 1]} : vector<16x128xf32> to vector<2x128xf32>
    %cst_34 = arith.constant dense<0.000000e+00> : vector<2x128xf32>
    %188 = tpu.matmul %186, %163, %cst_34 {dimension_numbers = #tpu.dot_dimension_numbers<[1], [0], [0], [1], [0, 0, 1, 1], [], []>} : vector<2x32xbf16>, vector<32x128xbf16>, vector<2x128xf32> -> vector<2x128xf32>
    %189 = arith.addf %187, %188 : vector<2x128xf32>
    %190 = arith.negf %189 : vector<2x128xf32>
    %191 = math.exp %190 : vector<2x128xf32>
    %cst_35 = arith.constant 1.000000e+00 : f32
    %192 = vector.broadcast %cst_35 : f32 to vector<2x128xf32>
    %193 = arith.addf %192, %191 : vector<2x128xf32>
    %194 = arith.divf %192, %193 : vector<2x128xf32>
    %195 = vector.extract_strided_slice %194 {offsets = [0, 0], sizes = [2, 32], strides = [1, 1]} : vector<2x128xf32> to vector<2x32xf32>
    %196 = vector.extract_strided_slice %194 {offsets = [0, 32], sizes = [2, 32], strides = [1, 1]} : vector<2x128xf32> to vector<2x32xf32>
    %197 = vector.extract_strided_slice %194 {offsets = [0, 96], sizes = [2, 32], strides = [1, 1]} : vector<2x128xf32> to vector<2x32xf32>
    %198 = vector.extract_strided_slice %189 {offsets = [0, 64], sizes = [2, 32], strides = [1, 1]} : vector<2x128xf32> to vector<2x32xf32>
    %199 = math.tanh %198 : vector<2x32xf32>
    %200 = arith.mulf %196, %183 : vector<2x32xf32>
    %201 = arith.mulf %195, %199 : vector<2x32xf32>
    %202 = arith.addf %200, %201 : vector<2x32xf32>
    %203 = math.tanh %202 : vector<2x32xf32>
    %204 = arith.mulf %197, %203 : vector<2x32xf32>
    %205 = arith.truncf %204 : vector<2x32xf32> to vector<2x32xbf16>
    %206 = vector.extract_strided_slice %168 {offsets = [4, 0], sizes = [2, 128], strides = [1, 1]} : vector<16x128xf32> to vector<2x128xf32>
    %cst_36 = arith.constant dense<0.000000e+00> : vector<2x128xf32>
    %207 = tpu.matmul %205, %163, %cst_36 {dimension_numbers = #tpu.dot_dimension_numbers<[1], [0], [0], [1], [0, 0, 1, 1], [], []>} : vector<2x32xbf16>, vector<32x128xbf16>, vector<2x128xf32> -> vector<2x128xf32>
    %208 = arith.addf %206, %207 : vector<2x128xf32>
    %209 = arith.negf %208 : vector<2x128xf32>
    %210 = math.exp %209 : vector<2x128xf32>
    %cst_37 = arith.constant 1.000000e+00 : f32
    %211 = vector.broadcast %cst_37 : f32 to vector<2x128xf32>
    %212 = arith.addf %211, %210 : vector<2x128xf32>
    %213 = arith.divf %211, %212 : vector<2x128xf32>
    %214 = vector.extract_strided_slice %213 {offsets = [0, 0], sizes = [2, 32], strides = [1, 1]} : vector<2x128xf32> to vector<2x32xf32>
    %215 = vector.extract_strided_slice %213 {offsets = [0, 32], sizes = [2, 32], strides = [1, 1]} : vector<2x128xf32> to vector<2x32xf32>
    %216 = vector.extract_strided_slice %213 {offsets = [0, 96], sizes = [2, 32], strides = [1, 1]} : vector<2x128xf32> to vector<2x32xf32>
    %217 = vector.extract_strided_slice %208 {offsets = [0, 64], sizes = [2, 32], strides = [1, 1]} : vector<2x128xf32> to vector<2x32xf32>
    %218 = math.tanh %217 : vector<2x32xf32>
    %219 = arith.mulf %215, %202 : vector<2x32xf32>
    %220 = arith.mulf %214, %218 : vector<2x32xf32>
    %221 = arith.addf %219, %220 : vector<2x32xf32>
    %222 = math.tanh %221 : vector<2x32xf32>
    %223 = arith.mulf %216, %222 : vector<2x32xf32>
    %224 = arith.truncf %223 : vector<2x32xf32> to vector<2x32xbf16>
    %225 = vector.extract_strided_slice %168 {offsets = [6, 0], sizes = [2, 128], strides = [1, 1]} : vector<16x128xf32> to vector<2x128xf32>
    %cst_38 = arith.constant dense<0.000000e+00> : vector<2x128xf32>
    %226 = tpu.matmul %224, %163, %cst_38 {dimension_numbers = #tpu.dot_dimension_numbers<[1], [0], [0], [1], [0, 0, 1, 1], [], []>} : vector<2x32xbf16>, vector<32x128xbf16>, vector<2x128xf32> -> vector<2x128xf32>
    %227 = arith.addf %225, %226 : vector<2x128xf32>
    %228 = arith.negf %227 : vector<2x128xf32>
    %229 = math.exp %228 : vector<2x128xf32>
    %cst_39 = arith.constant 1.000000e+00 : f32
    %230 = vector.broadcast %cst_39 : f32 to vector<2x128xf32>
    %231 = arith.addf %230, %229 : vector<2x128xf32>
    %232 = arith.divf %230, %231 : vector<2x128xf32>
    %233 = vector.extract_strided_slice %232 {offsets = [0, 0], sizes = [2, 32], strides = [1, 1]} : vector<2x128xf32> to vector<2x32xf32>
    %234 = vector.extract_strided_slice %232 {offsets = [0, 32], sizes = [2, 32], strides = [1, 1]} : vector<2x128xf32> to vector<2x32xf32>
    %235 = vector.extract_strided_slice %232 {offsets = [0, 96], sizes = [2, 32], strides = [1, 1]} : vector<2x128xf32> to vector<2x32xf32>
    %236 = vector.extract_strided_slice %227 {offsets = [0, 64], sizes = [2, 32], strides = [1, 1]} : vector<2x128xf32> to vector<2x32xf32>
    %237 = math.tanh %236 : vector<2x32xf32>
    %238 = arith.mulf %234, %221 : vector<2x32xf32>
    %239 = arith.mulf %233, %237 : vector<2x32xf32>
    %240 = arith.addf %238, %239 : vector<2x32xf32>
    %241 = math.tanh %240 : vector<2x32xf32>
    %242 = arith.mulf %235, %241 : vector<2x32xf32>
    %243 = arith.truncf %242 : vector<2x32xf32> to vector<2x32xbf16>
    %244 = vector.extract_strided_slice %168 {offsets = [8, 0], sizes = [2, 128], strides = [1, 1]} : vector<16x128xf32> to vector<2x128xf32>
    %cst_40 = arith.constant dense<0.000000e+00> : vector<2x128xf32>
    %245 = tpu.matmul %243, %163, %cst_40 {dimension_numbers = #tpu.dot_dimension_numbers<[1], [0], [0], [1], [0, 0, 1, 1], [], []>} : vector<2x32xbf16>, vector<32x128xbf16>, vector<2x128xf32> -> vector<2x128xf32>
    %246 = arith.addf %244, %245 : vector<2x128xf32>
    %247 = arith.negf %246 : vector<2x128xf32>
    %248 = math.exp %247 : vector<2x128xf32>
    %cst_41 = arith.constant 1.000000e+00 : f32
    %249 = vector.broadcast %cst_41 : f32 to vector<2x128xf32>
    %250 = arith.addf %249, %248 : vector<2x128xf32>
    %251 = arith.divf %249, %250 : vector<2x128xf32>
    %252 = vector.extract_strided_slice %251 {offsets = [0, 0], sizes = [2, 32], strides = [1, 1]} : vector<2x128xf32> to vector<2x32xf32>
    %253 = vector.extract_strided_slice %251 {offsets = [0, 32], sizes = [2, 32], strides = [1, 1]} : vector<2x128xf32> to vector<2x32xf32>
    %254 = vector.extract_strided_slice %251 {offsets = [0, 96], sizes = [2, 32], strides = [1, 1]} : vector<2x128xf32> to vector<2x32xf32>
    %255 = vector.extract_strided_slice %246 {offsets = [0, 64], sizes = [2, 32], strides = [1, 1]} : vector<2x128xf32> to vector<2x32xf32>
    %256 = math.tanh %255 : vector<2x32xf32>
    %257 = arith.mulf %253, %240 : vector<2x32xf32>
    %258 = arith.mulf %252, %256 : vector<2x32xf32>
    %259 = arith.addf %257, %258 : vector<2x32xf32>
    %260 = math.tanh %259 : vector<2x32xf32>
    %261 = arith.mulf %254, %260 : vector<2x32xf32>
    %262 = arith.truncf %261 : vector<2x32xf32> to vector<2x32xbf16>
    %263 = vector.extract_strided_slice %168 {offsets = [10, 0], sizes = [2, 128], strides = [1, 1]} : vector<16x128xf32> to vector<2x128xf32>
    %cst_42 = arith.constant dense<0.000000e+00> : vector<2x128xf32>
    %264 = tpu.matmul %262, %163, %cst_42 {dimension_numbers = #tpu.dot_dimension_numbers<[1], [0], [0], [1], [0, 0, 1, 1], [], []>} : vector<2x32xbf16>, vector<32x128xbf16>, vector<2x128xf32> -> vector<2x128xf32>
    %265 = arith.addf %263, %264 : vector<2x128xf32>
    %266 = arith.negf %265 : vector<2x128xf32>
    %267 = math.exp %266 : vector<2x128xf32>
    %cst_43 = arith.constant 1.000000e+00 : f32
    %268 = vector.broadcast %cst_43 : f32 to vector<2x128xf32>
    %269 = arith.addf %268, %267 : vector<2x128xf32>
    %270 = arith.divf %268, %269 : vector<2x128xf32>
    %271 = vector.extract_strided_slice %270 {offsets = [0, 0], sizes = [2, 32], strides = [1, 1]} : vector<2x128xf32> to vector<2x32xf32>
    %272 = vector.extract_strided_slice %270 {offsets = [0, 32], sizes = [2, 32], strides = [1, 1]} : vector<2x128xf32> to vector<2x32xf32>
    %273 = vector.extract_strided_slice %270 {offsets = [0, 96], sizes = [2, 32], strides = [1, 1]} : vector<2x128xf32> to vector<2x32xf32>
    %274 = vector.extract_strided_slice %265 {offsets = [0, 64], sizes = [2, 32], strides = [1, 1]} : vector<2x128xf32> to vector<2x32xf32>
    %275 = math.tanh %274 : vector<2x32xf32>
    %276 = arith.mulf %272, %259 : vector<2x32xf32>
    %277 = arith.mulf %271, %275 : vector<2x32xf32>
    %278 = arith.addf %276, %277 : vector<2x32xf32>
    %279 = math.tanh %278 : vector<2x32xf32>
    %280 = arith.mulf %273, %279 : vector<2x32xf32>
    %281 = arith.truncf %280 : vector<2x32xf32> to vector<2x32xbf16>
    %282 = vector.extract_strided_slice %168 {offsets = [12, 0], sizes = [2, 128], strides = [1, 1]} : vector<16x128xf32> to vector<2x128xf32>
    %cst_44 = arith.constant dense<0.000000e+00> : vector<2x128xf32>
    %283 = tpu.matmul %281, %163, %cst_44 {dimension_numbers = #tpu.dot_dimension_numbers<[1], [0], [0], [1], [0, 0, 1, 1], [], []>} : vector<2x32xbf16>, vector<32x128xbf16>, vector<2x128xf32> -> vector<2x128xf32>
    %284 = arith.addf %282, %283 : vector<2x128xf32>
    %285 = arith.negf %284 : vector<2x128xf32>
    %286 = math.exp %285 : vector<2x128xf32>
    %cst_45 = arith.constant 1.000000e+00 : f32
    %287 = vector.broadcast %cst_45 : f32 to vector<2x128xf32>
    %288 = arith.addf %287, %286 : vector<2x128xf32>
    %289 = arith.divf %287, %288 : vector<2x128xf32>
    %290 = vector.extract_strided_slice %289 {offsets = [0, 0], sizes = [2, 32], strides = [1, 1]} : vector<2x128xf32> to vector<2x32xf32>
    %291 = vector.extract_strided_slice %289 {offsets = [0, 32], sizes = [2, 32], strides = [1, 1]} : vector<2x128xf32> to vector<2x32xf32>
    %292 = vector.extract_strided_slice %289 {offsets = [0, 96], sizes = [2, 32], strides = [1, 1]} : vector<2x128xf32> to vector<2x32xf32>
    %293 = vector.extract_strided_slice %284 {offsets = [0, 64], sizes = [2, 32], strides = [1, 1]} : vector<2x128xf32> to vector<2x32xf32>
    %294 = math.tanh %293 : vector<2x32xf32>
    %295 = arith.mulf %291, %278 : vector<2x32xf32>
    %296 = arith.mulf %290, %294 : vector<2x32xf32>
    %297 = arith.addf %295, %296 : vector<2x32xf32>
    %298 = math.tanh %297 : vector<2x32xf32>
    %299 = arith.mulf %292, %298 : vector<2x32xf32>
    %300 = arith.truncf %299 : vector<2x32xf32> to vector<2x32xbf16>
    %301 = vector.extract_strided_slice %168 {offsets = [14, 0], sizes = [2, 128], strides = [1, 1]} : vector<16x128xf32> to vector<2x128xf32>
    %cst_46 = arith.constant dense<0.000000e+00> : vector<2x128xf32>
    %302 = tpu.matmul %300, %163, %cst_46 {dimension_numbers = #tpu.dot_dimension_numbers<[1], [0], [0], [1], [0, 0, 1, 1], [], []>} : vector<2x32xbf16>, vector<32x128xbf16>, vector<2x128xf32> -> vector<2x128xf32>
    %303 = arith.addf %301, %302 : vector<2x128xf32>
    %304 = arith.negf %303 : vector<2x128xf32>
    %305 = math.exp %304 : vector<2x128xf32>
    %cst_47 = arith.constant 1.000000e+00 : f32
    %306 = vector.broadcast %cst_47 : f32 to vector<2x128xf32>
    %307 = arith.addf %306, %305 : vector<2x128xf32>
    %308 = arith.divf %306, %307 : vector<2x128xf32>
    %309 = vector.extract_strided_slice %308 {offsets = [0, 0], sizes = [2, 32], strides = [1, 1]} : vector<2x128xf32> to vector<2x32xf32>
    %310 = vector.extract_strided_slice %308 {offsets = [0, 32], sizes = [2, 32], strides = [1, 1]} : vector<2x128xf32> to vector<2x32xf32>
    %311 = vector.extract_strided_slice %308 {offsets = [0, 96], sizes = [2, 32], strides = [1, 1]} : vector<2x128xf32> to vector<2x32xf32>
    %312 = vector.extract_strided_slice %303 {offsets = [0, 64], sizes = [2, 32], strides = [1, 1]} : vector<2x128xf32> to vector<2x32xf32>
    %313 = math.tanh %312 : vector<2x32xf32>
    %314 = arith.mulf %310, %297 : vector<2x32xf32>
    %315 = arith.mulf %309, %313 : vector<2x32xf32>
    %316 = arith.addf %314, %315 : vector<2x32xf32>
    %317 = math.tanh %316 : vector<2x32xf32>
    %318 = arith.mulf %311, %317 : vector<2x32xf32>
    %c0_48 = arith.constant 0 : index
    %c0_49 = arith.constant 0 : index
    %319 = vector.load %arg1[%c0_48, %c0_49] : memref<2x32xf32, #tpu.memory_space<vmem>>, vector<2x32xf32>
    %320 = arith.addf %318, %319 : vector<2x32xf32>
    %321 = arith.truncf %320 : vector<2x32xf32> to vector<2x32xbf16>
    %c0_50 = arith.constant 0 : index
    %c0_51 = arith.constant 0 : index
    %322 = vector.load %arg2[%c0_50, %c0_51] : memref<32x4xbf16, #tpu.memory_space<vmem>>, vector<32x4xbf16>
    %cst_52 = arith.constant dense<0.000000e+00> : vector<2x4xf32>
    %323 = tpu.matmul %321, %322, %cst_52 {dimension_numbers = #tpu.dot_dimension_numbers<[1], [0], [0], [1], [0, 0, 1, 1], [], []>} : vector<2x32xbf16>, vector<32x4xbf16>, vector<2x4xf32> -> vector<2x4xf32>
    %c0_53 = arith.constant 0 : index
    %c0_54 = arith.constant 0 : index
    %324 = vector.load %arg3[%c0_53, %c0_54] : memref<1x4xf32, #tpu.memory_space<vmem>>, vector<1x4xf32>
    %325 = vector.broadcast %324 : vector<1x4xf32> to vector<2x4xf32>
    %326 = arith.addf %323, %325 : vector<2x4xf32>
    %c0_55 = arith.constant 0 : index
    %c0_56 = arith.constant 0 : index
    %327 = vector.load %arg7[%c0_55, %c0_56] : memref<2x4xf32, #tpu.memory_space<vmem>>, vector<2x4xf32>
    tpu.vector_store %arg7[%c0_55, %c0_56], %326 {strides = array<i32>} : memref<2x4xf32, #tpu.memory_space<vmem>>, vector<2x4xf32>,
    return
  }
}

</mosaic_0001>

<bundles_post_ra>
// kernel: tpu_custom_call.1
= control target key start
LH: loop header
LB: loop body
LE: loop exit
PB: predicated region body
PF: predicated region fallthrough
CT: control target
= control target key end

     0   :  { %12 = vsyncpa [#allocation3], 0  ;;  %s2275_s0 = inlined_call_operand.hbm [shape: bf16[16,16], index: 0, kind: input, shape index: {}]   ;;  %s2276_s1 = inlined_call_operand.hbm [shape: f32[2,32], index: 1, kind: input, shape index: {}]   ;;  %s2277_s2 = inlined_call_operand.vmem [shape: bf16[32,4], index: 2, kind: input, shape index: {}]   ;;  %s2278_s3 = inlined_call_operand.vmem [shape: f32[1,4], index: 3, kind: input, shape index: {}]   ;;  %s2279_s4 = inlined_call_operand.vmem [shape: bf16[48,128], index: 4, kind: input, shape index: {}]   ;;  %s2280_s5 = inlined_call_operand.hbm [shape: bf16[2,32,128], index: 5, kind: input, shape index: {}]   ;;  %s2281_s6 = inlined_call_operand.vmem [shape: f32[2,1,128], index: 6, kind: input, shape index: {}]   ;;  %s2282_s7 = inlined_call_operand.hbm [shape: f32[2,4], index: 7, kind: output, shape index: {}]  }
   0x1   :  { %13 = vsyncpa [#allocation6], 0 }
   0x2   :  { %14 = vsyncpa [#allocation4], 0  ;;  %s1972_s24 = smov [#allocation5]   ;;  %s1973_s26 = smov [#allocation2]  }
   0x3   :  { %s33_s25 = sshll.u32 %s1972_s24, 4  ;;  %s20_s27 = sshll.u32 %s1973_s26, 4  ;;  %s34_s25 = int_to_ptr.vmem [resolvable:$true] %s33_s25  ;;  %s21_s27 = int_to_ptr.vmem [resolvable:$true] %s20_s27 }
   0x4   :  { %s1894_s28 = scalar_lea.vmem %s34_s25, 32  ;;  %p1899_p1 = scmp.lt.s32.totalorder %s34_s25, %s34_s25 }
   0x5   :  { %p1895_p0 = scmp.ne.s32.totalorder %s34_s25, %s1894_s28  ;;  %p1900_p2 = scmp.lt.s32.totalorder %s1894_s28, %s1894_s28 }
   0x7   :  { %p1901_p3 = por %p1900_p2, %p1899_p1 }
   0x9   :  { %p1902_p4 = pnand %p1901_p3, %p1895_p0 }
   0xb   :  { %1905 = shalt.err (!%p1902_p4)
}
   0xc   :  { %36 = dma.hbm_to_vmem [thread:$0]  %s2276_s1, 32, %s34_s25, [#allocation6]  }
   0xd   :  { %s1914_s8 = scalar_lea.vmem %s21_s27, 128  ;;  %p1919_p6 = scmp.lt.s32.totalorder %s21_s27, %s21_s27 }
   0xe   :  { %p1915_p5 = scmp.ne.s32.totalorder %s21_s27, %s1914_s8  ;;  %p1920_p7 = scmp.lt.s32.totalorder %s1914_s8, %s1914_s8 }
  0x10   :  { %p1921_p8 = por %p1920_p7, %p1919_p6 }
  0x12   :  { %p1922_p9 = pnand %p1921_p8, %p1915_p5 }
  0x14   :  { %1925 = shalt.err (!%p1922_p9)
}
  0x15   :  { %s1974_s9 = smov 64   ;;  %s1975_s10 = smov 4  }
  0x16   :  { %26 = dma.hbm_to_vmem [thread:$0]  %s2275_s0, 128, %s21_s27, [#allocation3], %s1974_s9, %s1974_s9, %s1975_s10  }
  0x17   :  { %s1976_s13 = smov [#allocation7]  }
  0x18   :  { %s48_s14 = sshll.u32 %s1976_s13, 4  ;;  %s49_s14 = int_to_ptr.vmem [resolvable:$true] %s48_s14 }
  0x19   :  { %s1934_s15 = scalar_lea.vmem %s49_s14, 512  ;;  %p1939_p11 = scmp.lt.s32.totalorder %s49_s14, %s49_s14 }
  0x1a   :  { %p1935_p10 = scmp.ne.s32.totalorder %s49_s14, %s1934_s15  ;;  %p1940_p12 = scmp.lt.s32.totalorder %s1934_s15, %s1934_s15 }
  0x1c   :  { %p1941_p13 = por %p1940_p12, %p1939_p11 }
  0x1e   :  { %p1942_p0 = pnand %p1941_p13, %p1935_p10 }
  0x20   :  { %1945 = shalt.err (!%p1942_p0)
}
  0x21   :  { %54 = dma.hbm_to_vmem [thread:$0]  %s2280_s5, 512, %s49_s14, [#allocation6], %s1974_s9, %s1974_s9, %s1975_s10  }
  0x22   :  { %1966 = dma.done.wait [#allocation3], 128  }
  0x23   :  { %1967 = vsyncadd [#allocation3], 4294967168 }
  0x24   :  { %1968 = dma.done.wait [#allocation6], 544  }
  0x25   :  { %1969 = vsyncadd [#allocation6], 4294966752  ;;  %v1977_v0 = vmov 0.0   ;;  %vm1978_vm0 = vmmov 0   ;;  %v1748_v1 = vld [vmem:[%s2279_s4] sm:$0xff]   ;;  %vm93_vm1 = vcmask 130048  }
  0x26   :  { %1604 = vmatprep.subr.bf16.mxu0 %v1977_v0  ;;  %1606 = vmatprep.mubr.msk.bf16.mxu0 %vm1978_vm0, %v1977_v0  ;;  %v1749_v2 = vld [vmem:[#allocation2] sm:$0xff]   ;;  %s1979_s19 = smov 32   ;;  %v2058_v20 = vld [vmem:[#allocation7 + $0x8] sm:$0xff]   ;;  %v2061_v21 = vld [vmem:[#allocation7] sm:$0xff]   ;;  %vm178_vm2 = vcmask 261120   ;;  %vm729_vm3 = vcmask 1040384  }
  0x27   :  { %1610 = vmatprep.subr.bf16.mxu1 %v1977_v0  ;;  %1614 = vmatprep.mubr.msk.bf16.mxu1 %vm1978_vm0, %v1977_v0  ;;  %v1507_v3 = vld [vmem:[%s2281_s6] ss:$0 sm:$0xff]  ;;  %vm733_vm4 = vcmask 1041408   ;;  %vm736_vm5 = vcmask 1042432   ;;  %vm739_vm6 = vcmask 1043456   ;;  %vm742_vm7 = vcmask 1044480  }
  0x28   :  { %1605 = vmatpush3.bf16.msra.mxu0 %v1748_v1  ;;  %1611 = vmatpush3.bf16.msra.mxu1 %v2058_v20  ;;  %vm745_vm8 = vcmask 1045504   ;;  %vm748_vm9 = vcmask 1046528   ;;  %vm1489_vm10 = vcmask 25600  }
  0x29   :  { %1618 = vmatprep.subr.bf16.mxu0 %v1977_v0  ;;  %1612 = vmatprep.subr.bf16.mxu1 %v1977_v0 }
  0x2b   :  { %1607 = vmatmul.mubr.msk.bf16.vlgmr.msra.gmra.mxu0 %vm93_vm1, %v1749_v2 }
  0x2c   :  { %1622 = vmatprep.mubr.msk.bf16.mxu0 %vm1978_vm0, %v1977_v0  ;;  %1619 = vmatpush3.bf16.msra.mxu0 %v2058_v20 }
  0x2d   :  { %1620 = vmatprep.subr.bf16.mxu0 %v1977_v0  ;;  %1613 = vmatpush3.bf16.msra.mxu1 %v2061_v21 }
  0x2e   :  { %1626 = vmatprep.subr.bf16.mxu1 %v1977_v0 }
  0x30   :  { %1621 = vmatpush3.bf16.msra.mxu0 %v2061_v21 }
  0x31   :  { %1634 = vmatprep.subr.bf16.mxu0 %v1977_v0 }
  0xeb   :  { %v131_v4 = vpop.f32.mrf.mxu0 }
  0xec   :  { %v2050_v5 = vadd.f32 %v1507_v3, %v131_v4 }
  0xed   :  { %v1608_v6 = vpop.f32.mrf.mxu0 }
  0xee   :  { %1758 = vtanh.f32 %v2050_v5  ;;  %v1511_v11 = vmul.f32 -1.442695, %v2050_v5 }
  0xef   :  { %v134_v7 = vpop.f32.mrf.mxu0 }
  0xf0   :  { %v2053_v8 = vadd.f32 %v1507_v3, %v134_v7  ;;  %1760 = vpow2.f32 %v1511_v11 }
  0xf1   :  { %v1609_v9 = vpop.f32.mrf.mxu0 }
  0xfb   :  { %v1759_v10 = vpop.eup %1758 }
  0xfc   :  { %147 = vrot.lane.b32.xlu0 %v1759_v10, %s1974_s9 }
  0xfd   :  { %v1761_v12 = vpop.eup %1760 }
  0xfe   :  { %v141_v13 = vadd.f32 1.0, %v1761_v12 }
 0x100   :  { %1762 = vrcp.f32 %v141_v13 }
 0x10d   :  { %v1763_v14 = vpop.eup %1762 }
 0x10e   :  { %v145_v17 = vmul.f32 0.0, %v1763_v14 }
 0x16e   :  { %v148_v15 = vpop.permute.xlu0 %147 }
 0x16f   :  { %v150_v16 = vmul.f32 %v1763_v14, %v148_v15 }
 0x171   :  { %152 = vrot.lane.b32.xlu0 %v150_v16, %s1979_s19 }
 0x1e3   :  { %v153_v18 = vpop.permute.xlu0 %152 }
 0x1e4   :  { %v155_v19 = vadd.f32 %v153_v18, %v145_v17 }
 0x1e6   :  { %1764 = vtanh.f32 %v155_v19  ;;  %v234_v40 = vrot.slane %v155_v19, 6 }
 0x1f3   :  { %v1765_v22 = vpop.eup %1764 }
 0x1f4   :  { %158 = vrot.lane.b32.xlu1 %v1765_v22, %s1974_s9 }
 0x266   :  { %v159_v23 = vpop.permute.xlu1 %158 }
 0x267   :  { %v161_v24 = vmul.f32 %v1763_v14, %v159_v23 }
 0x269   :  { %v2071_v25 = vpack.c.bf16 %v161_v24, %v161_v24 }
 0x26b   :  { %164 = vrot.lane.b32.xlu1 %v2071_v25, %s1979_s19 }
 0x2dd   :  { %v165_v26 = vpop.permute.xlu1 %164 }
 0x2de   :  { %1615 = vmatmul.mubr.msk.bf16.vlgmr.msra.gmra.mxu1 %vm178_vm2, %v165_v26 }
 0x2df   :  { %1627 = vmatpush3.bf16.msra.mxu1 %v2058_v20  ;;  %1630 = vmatprep.mubr.msk.bf16.mxu1 %vm1978_vm0, %v1977_v0 }
 0x2e0   :  { %1628 = vmatprep.subr.bf16.mxu1 %v1977_v0 }
 0x2e3   :  { %1629 = vmatpush3.bf16.msra.mxu1 %v2061_v21 }
 0x2e4   :  { %1642 = vmatprep.subr.bf16.mxu1 %v1977_v0 }
 0x39e   :  { %v216_v27 = vpop.f32.mrf.mxu1 }
 0x39f   :  { %v223_v28 = vrot.slane %v216_v27, 6 }
 0x3a0   :  { %v1616_v29 = vpop.f32.mrf.mxu1 }
 0x3a1   :  { %v225_v30 = vadd.f32 %v223_v28, %v2050_v5 }
 0x3a2   :  { %v219_v31 = vpop.f32.mrf.mxu1 }
 0x3a3   :  { %1766 = vtanh.f32 %v225_v30  ;;  %v1515_v34 = vmul.f32 -1.442695, %v225_v30 }
 0x3a4   :  { %v1617_v32 = vpop.f32.mrf.mxu1 }
 0x3a5   :  { %1768 = vpow2.f32 %v1515_v34 }
 0x3b0   :  { %v1767_v33 = vpop.eup %1766 }
 0x3b1   :  { %238 = vrot.lane.b32.xlu0 %v1767_v33, %s1974_s9 }
 0x3b2   :  { %v1769_v35 = vpop.eup %1768 }
 0x3b3   :  { %v229_v36 = vadd.f32 1.0, %v1769_v35 }
 0x3b5   :  { %1770 = vrcp.f32 %v229_v36 }
 0x3c2   :  { %v1771_v37 = vpop.eup %1770 }
 0x3c3   :  { %v236_v41 = vmul.f32 %v1771_v37, %v234_v40 }
 0x423   :  { %v239_v38 = vpop.permute.xlu0 %238 }
 0x424   :  { %v241_v39 = vmul.f32 %v1771_v37, %v239_v38 }
 0x426   :  { %243 = vrot.lane.b32.xlu1 %v241_v39, %s1979_s19 }
 0x498   :  { %v244_v42 = vpop.permute.xlu1 %243 }
 0x499   :  { %v246_v43 = vadd.f32 %v244_v42, %v236_v41 }
 0x49b   :  { %1772 = vtanh.f32 %v246_v43  ;;  %v313_v63 = vrot.slane %v246_v43, 6 }
 0x4a8   :  { %v1773_v44 = vpop.eup %1772 }
 0x4a9   :  { %249 = vrot.lane.b32.xlu0 %v1773_v44, %s1974_s9 }
 0x51b   :  { %v250_v45 = vpop.permute.xlu0 %249 }
 0x51c   :  { %v252_v46 = vmul.f32 %v1771_v37, %v250_v45 }
 0x51e   :  { %v253_v47 = vpack.c.bf16 %v252_v46, %v252_v46 }
 0x520   :  { %v255_v48 = vrot.slane %v253_v47, 1  ;;  %v732_v10 = vsel %vm729_vm3, %v2071_v25, %v253_v47 }
 0x522   :  { %256 = vrot.lane.b32.xlu1 %v255_v48, %s1979_s19 }
 0x594   :  { %v257_v49 = vpop.permute.xlu1 %256 }
 0x595   :  { %1623 = vmatmul.mubr.msk.bf16.vlgmr.msra.gmra.mxu0 %vm178_vm2, %v257_v49 }
 0x596   :  { %1635 = vmatpush3.bf16.msra.mxu0 %v2058_v20  ;;  %1638 = vmatprep.mubr.msk.bf16.mxu0 %vm1978_vm0, %v1977_v0 }
 0x597   :  { %1636 = vmatprep.subr.bf16.mxu0 %v1977_v0 }
 0x59a   :  { %1637 = vmatpush3.bf16.msra.mxu0 %v2061_v21 }
 0x59b   :  { %1650 = vmatprep.subr.bf16.mxu0 %v1977_v0 }
 0x655   :  { %v295_v50 = vpop.f32.mrf.mxu0 }
 0x656   :  { %v302_v51 = vrot.slane %v295_v50, 4 }
 0x657   :  { %v1624_v52 = vpop.f32.mrf.mxu0 }
 0x658   :  { %v304_v53 = vadd.f32 %v302_v51, %v2050_v5 }
 0x659   :  { %v298_v54 = vpop.f32.mrf.mxu0 }
 0x65a   :  { %1774 = vtanh.f32 %v304_v53  ;;  %v1517_v57 = vmul.f32 -1.442695, %v304_v53 }
 0x65b   :  { %v1625_v55 = vpop.f32.mrf.mxu0 }
 0x65c   :  { %1776 = vpow2.f32 %v1517_v57 }
 0x667   :  { %v1775_v56 = vpop.eup %1774 }
 0x668   :  { %317 = vrot.lane.b32.xlu0 %v1775_v56, %s1974_s9 }
 0x669   :  { %v1777_v58 = vpop.eup %1776 }
 0x66a   :  { %v308_v59 = vadd.f32 1.0, %v1777_v58 }
 0x66c   :  { %1778 = vrcp.f32 %v308_v59 }
 0x679   :  { %v1779_v60 = vpop.eup %1778 }
 0x67a   :  { %v315_v1 = vmul.f32 %v1779_v60, %v313_v63 }
 0x6da   :  { %v318_v61 = vpop.permute.xlu0 %317 }
 0x6db   :  { %v320_v62 = vmul.f32 %v1779_v60, %v318_v61 }
 0x6dd   :  { %322 = vrot.lane.b32.xlu1 %v320_v62, %s1979_s19 }
 0x74f   :  { %v323_v2 = vpop.permute.xlu1 %322 }
 0x750   :  { %v325_v3 = vadd.f32 %v323_v2, %v315_v1 }
 0x752   :  { %1780 = vtanh.f32 %v325_v3  ;;  %v392_v29 = vrot.slane %v325_v3, 6 }
 0x75f   :  { %v1781_v4 = vpop.eup %1780 }
 0x760   :  { %328 = vrot.lane.b32.xlu0 %v1781_v4, %s1974_s9 }
 0x7d2   :  { %v329_v6 = vpop.permute.xlu0 %328 }
 0x7d3   :  { %v331_v7 = vmul.f32 %v1779_v60, %v329_v6 }
 0x7d5   :  { %v332_v9 = vpack.c.bf16 %v331_v7, %v331_v7 }
 0x7d7   :  { %v334_v11 = vrot.slane %v332_v9, 2  ;;  %v735_v12 = vsel %vm733_vm4, %v732_v10, %v332_v9 }
 0x7d9   :  { %335 = vrot.lane.b32.xlu1 %v334_v11, %s1979_s19 }
 0x84b   :  { %v336_v13 = vpop.permute.xlu1 %335 }
 0x84c   :  { %1631 = vmatmul.mubr.msk.bf16.vlgmr.msra.gmra.mxu1 %vm178_vm2, %v336_v13 }
 0x84d   :  { %1643 = vmatpush3.bf16.msra.mxu1 %v2058_v20  ;;  %1646 = vmatprep.mubr.msk.bf16.mxu1 %vm1978_vm0, %v1977_v0 }
 0x84e   :  { %1644 = vmatprep.subr.bf16.mxu1 %v1977_v0 }
 0x851   :  { %1645 = vmatpush3.bf16.msra.mxu1 %v2061_v21 }
 0x852   :  { %1658 = vmatprep.subr.bf16.mxu1 %v1977_v0 }
 0x90c   :  { %v374_v14 = vpop.f32.mrf.mxu1 }
 0x90d   :  { %v381_v15 = vrot.slane %v374_v14, 2 }
 0x90e   :  { %v1632_v16 = vpop.f32.mrf.mxu1 }
 0x90f   :  { %v383_v17 = vadd.f32 %v381_v15, %v2050_v5 }
 0x910   :  { %v377_v18 = vpop.f32.mrf.mxu1 }
 0x911   :  { %1782 = vtanh.f32 %v383_v17  ;;  %v1519_v23 = vmul.f32 -1.442695, %v383_v17 }
 0x912   :  { %v1633_v19 = vpop.f32.mrf.mxu1 }
 0x913   :  { %1784 = vpow2.f32 %v1519_v23 }
 0x91e   :  { %v1783_v22 = vpop.eup %1782 }
 0x91f   :  { %396 = vrot.lane.b32.xlu0 %v1783_v22, %s1974_s9 }
 0x920   :  { %v1785_v24 = vpop.eup %1784 }
 0x921   :  { %v387_v25 = vadd.f32 1.0, %v1785_v24 }
 0x923   :  { %1786 = vrcp.f32 %v387_v25 }
 0x930   :  { %v1787_v26 = vpop.eup %1786 }
 0x931   :  { %v394_v30 = vmul.f32 %v1787_v26, %v392_v29 }
 0x991   :  { %v397_v27 = vpop.permute.xlu0 %396 }
 0x992   :  { %v399_v28 = vmul.f32 %v1787_v26, %v397_v27 }
 0x994   :  { %401 = vrot.lane.b32.xlu1 %v399_v28, %s1979_s19 }
 0xa06   :  { %v402_v31 = vpop.permute.xlu1 %401 }
 0xa07   :  { %v404_v5 = vadd.f32 %v402_v31, %v394_v30 }
 0xa09   :  { %1788 = vtanh.f32 %v404_v5  ;;  %v468_v51 = vrot.slane %v404_v5, 6 }
 0xa16   :  { %v1789_v32 = vpop.eup %1788 }
 0xa17   :  { %407 = vrot.lane.b32.xlu0 %v1789_v32, %s1974_s9 }
 0xa89   :  { %v408_v33 = vpop.permute.xlu0 %407 }
 0xa8a   :  { %v410_v34 = vmul.f32 %v1787_v26, %v408_v33 }
 0xa8c   :  { %v411_v35 = vpack.c.bf16 %v410_v34, %v410_v34 }
 0xa8e   :  { %v413_v36 = vrot.slane %v411_v35, 3  ;;  %v738_v37 = vsel %vm736_vm5, %v735_v12, %v411_v35 }
 0xa90   :  { %414 = vrot.lane.b32.xlu1 %v413_v36, %s1979_s19 }
 0xb02   :  { %v415_v38 = vpop.permute.xlu1 %414 }
 0xb03   :  { %1639 = vmatmul.mubr.msk.bf16.vlgmr.msra.gmra.mxu0 %vm178_vm2, %v415_v38 }
 0xb04   :  { %1651 = vmatpush3.bf16.msra.mxu0 %v2058_v20  ;;  %1654 = vmatprep.mubr.msk.bf16.mxu0 %vm1978_vm0, %v1977_v0 }
 0xb05   :  { %1652 = vmatprep.subr.bf16.mxu0 %v1977_v0 }
 0xb08   :  { %1653 = vmatpush3.bf16.msra.mxu0 %v2061_v21 }
 0xb09   :  { %1666 = vmatprep.subr.bf16.mxu0 %v1977_v0 }
 0xbc3   :  { %v453_v39 = vpop.f32.mrf.mxu0 }
 0xbc4   :  { %v459_v40 = vadd.f32 %v453_v39, %v2053_v8 }
 0xbc5   :  { %v1640_v41 = vpop.f32.mrf.mxu0 }
 0xbc6   :  { %1790 = vtanh.f32 %v459_v40  ;;  %v1521_v45 = vmul.f32 -1.442695, %v459_v40 }
 0xbc7   :  { %v456_v42 = vpop.f32.mrf.mxu0 }
 0xbc8   :  { %1792 = vpow2.f32 %v1521_v45 }
 0xbc9   :  { %v1641_v43 = vpop.f32.mrf.mxu0 }
 0xbd3   :  { %v1791_v44 = vpop.eup %1790 }
 0xbd4   :  { %472 = vrot.lane.b32.xlu0 %v1791_v44, %s1974_s9 }
 0xbd5   :  { %v1793_v46 = vpop.eup %1792 }
 0xbd6   :  { %v463_v47 = vadd.f32 1.0, %v1793_v46 }
 0xbd8   :  { %1794 = vrcp.f32 %v463_v47 }
 0xbe5   :  { %v1795_v48 = vpop.eup %1794 }
 0xbe6   :  { %v470_v52 = vmul.f32 %v1795_v48, %v468_v51 }
 0xc46   :  { %v473_v49 = vpop.permute.xlu0 %472 }
 0xc47   :  { %v475_v50 = vmul.f32 %v1795_v48, %v473_v49 }
 0xc49   :  { %477 = vrot.lane.b32.xlu1 %v475_v50, %s1979_s19 }
 0xcbb   :  { %v478_v53 = vpop.permute.xlu1 %477 }
 0xcbc   :  { %v480_v54 = vadd.f32 %v478_v53, %v470_v52 }
 0xcbe   :  { %1796 = vtanh.f32 %v480_v54  ;;  %v546_v12 = vrot.slane %v480_v54, 6 }
 0xccb   :  { %v1797_v55 = vpop.eup %1796 }
 0xccc   :  { %483 = vrot.lane.b32.xlu0 %v1797_v55, %s1974_s9 }
 0xd3e   :  { %v484_v56 = vpop.permute.xlu0 %483 }
 0xd3f   :  { %v486_v57 = vmul.f32 %v1795_v48, %v484_v56 }
 0xd41   :  { %v487_v58 = vpack.c.bf16 %v486_v57, %v486_v57 }
 0xd43   :  { %v724_v59 = vrot.slane %v487_v58, 4  ;;  %489 = vrot.lane.b32.xlu1 %v487_v58, %s1979_s19 }
 0xd45   :  { %v741_v60 = vsel %vm739_vm6, %v738_v37, %v724_v59 }
 0xdb5   :  { %v490_v61 = vpop.permute.xlu1 %489 }
 0xdb6   :  { %1647 = vmatmul.mubr.msk.bf16.vlgmr.msra.gmra.mxu1 %vm178_vm2, %v490_v61 }
 0xdb7   :  { %1659 = vmatpush3.bf16.msra.mxu1 %v2058_v20  ;;  %1662 = vmatprep.mubr.msk.bf16.mxu1 %vm1978_vm0, %v1977_v0 }
 0xdb8   :  { %1660 = vmatprep.subr.bf16.mxu1 %v1977_v0 }
 0xdbb   :  { %1661 = vmatpush3.bf16.msra.mxu1 %v2061_v21 }
 0xdbc   :  { %1674 = vmatprep.subr.bf16.mxu1 %v1977_v0 }
 0xe76   :  { %v528_v62 = vpop.f32.mrf.mxu1 }
 0xe77   :  { %v535_v63 = vrot.slane %v528_v62, 6 }
 0xe78   :  { %v1648_v1 = vpop.f32.mrf.mxu1 }
 0xe79   :  { %v537_v2 = vadd.f32 %v535_v63, %v2053_v8 }
 0xe7a   :  { %v531_v3 = vpop.f32.mrf.mxu1 }
 0xe7b   :  { %1798 = vtanh.f32 %v537_v2  ;;  %v1523_v20 = vmul.f32 -1.442695, %v537_v2  ;;  %v1752_v3 = vld [vmem:[%s2279_s4 + $0x10] sm:$0xff]  }
 0xe7c   :  { %v1649_v4 = vpop.f32.mrf.mxu1 }
 0xe7d   :  { %1800 = vpow2.f32 %v1523_v20  ;;  %v1753_v4 = vld [vmem:[%s2279_s4 + $0x8] sm:$0xff]  }
 0xe88   :  { %v1799_v6 = vpop.eup %1798 }
 0xe89   :  { %550 = vrot.lane.b32.xlu0 %v1799_v6, %s1974_s9 }
 0xe8a   :  { %v1801_v7 = vpop.eup %1800 }
 0xe8b   :  { %v541_v9 = vadd.f32 1.0, %v1801_v7 }
 0xe8d   :  { %1802 = vrcp.f32 %v541_v9 }
 0xe9a   :  { %v1803_v10 = vpop.eup %1802 }
 0xe9b   :  { %v548_v13 = vmul.f32 %v1803_v10, %v546_v12  ;;  %v1529_v12 = vld [vmem:[%s2281_s6 + $0x1] ss:$0 sm:$0xff]  ;;  %s1980_s6 = smov 96  }
 0xefb   :  { %v551_v21 = vpop.permute.xlu0 %550 }
 0xefc   :  { %v553_v11 = vmul.f32 %v1803_v10, %v551_v21 }
 0xefe   :  { %555 = vrot.lane.b32.xlu1 %v553_v11, %s1979_s19 }
 0xf70   :  { %v556_v14 = vpop.permute.xlu1 %555 }
 0xf71   :  { %v558_v15 = vadd.f32 %v556_v14, %v548_v13 }
 0xf73   :  { %1804 = vtanh.f32 %v558_v15  ;;  %v625_v38 = vrot.slane %v558_v15, 6 }
 0xf80   :  { %v1805_v16 = vpop.eup %1804 }
 0xf81   :  { %561 = vrot.lane.b32.xlu0 %v1805_v16, %s1974_s9 }
 0xff3   :  { %v562_v17 = vpop.permute.xlu0 %561 }
 0xff4   :  { %v564_v18 = vmul.f32 %v1803_v10, %v562_v17 }
 0xff6   :  { %v565_v19 = vpack.c.bf16 %v564_v18, %v564_v18 }
 0xff8   :  { %v567_v22 = vrot.slane %v565_v19, 1  ;;  %v725_v23 = vrot.slane %v565_v19, 4 }
 0xffa   :  { %568 = vrot.lane.b32.xlu1 %v567_v22, %s1979_s19  ;;  %v744_v24 = vsel %vm742_vm7, %v741_v60, %v725_v23 }
0x106c   :  { %v569_v25 = vpop.permute.xlu1 %568 }
0x106d   :  { %1655 = vmatmul.mubr.msk.bf16.vlgmr.msra.gmra.mxu0 %vm178_vm2, %v569_v25 }
0x106e   :  { %1670 = vmatprep.mubr.msk.bf16.mxu0 %vm1978_vm0, %v1977_v0  ;;  %1667 = vmatpush3.bf16.msra.mxu0 %v1752_v3 }
0x106f   :  { %1668 = vmatprep.subr.bf16.mxu0 %v1977_v0 }
0x1072   :  { %1669 = vmatpush3.bf16.msra.mxu0 %v1753_v4 }
0x1073   :  { %1682 = vmatprep.subr.bf16.mxu0 %v1977_v0 }
0x112d   :  { %v607_v26 = vpop.f32.mrf.mxu0 }
0x112e   :  { %v614_v27 = vrot.slane %v607_v26, 4 }
0x112f   :  { %v1656_v28 = vpop.f32.mrf.mxu0 }
0x1130   :  { %v616_v29 = vadd.f32 %v614_v27, %v2053_v8 }
0x1131   :  { %v610_v30 = vpop.f32.mrf.mxu0 }
0x1132   :  { %1806 = vtanh.f32 %v616_v29  ;;  %v1525_v32 = vmul.f32 -1.442695, %v616_v29 }
0x1133   :  { %v1657_v31 = vpop.f32.mrf.mxu0 }
0x1134   :  { %1808 = vpow2.f32 %v1525_v32  ;;  %v2174_v31 = vld [vmem:[#allocation7 + $0x18] sm:$0xff]  }
0x113f   :  { %v1807_v5 = vpop.eup %1806 }
0x1140   :  { %629 = vrot.lane.b32.xlu0 %v1807_v5, %s1974_s9  ;;  %v2177_v5 = vld [vmem:[#allocation7 + $0x10] sm:$0xff]  }
0x1141   :  { %v1809_v33 = vpop.eup %1808 }
0x1142   :  { %v620_v34 = vadd.f32 1.0, %v1809_v33 }
0x1144   :  { %1810 = vrcp.f32 %v620_v34 }
0x1151   :  { %v1811_v35 = vpop.eup %1810 }
0x1152   :  { %v627_v39 = vmul.f32 %v1811_v35, %v625_v38 }
0x11b2   :  { %v630_v36 = vpop.permute.xlu0 %629 }
0x11b3   :  { %v632_v37 = vmul.f32 %v1811_v35, %v630_v36 }
0x11b5   :  { %634 = vrot.lane.b32.xlu1 %v632_v37, %s1979_s19 }
0x1227   :  { %v635_v40 = vpop.permute.xlu1 %634 }
0x1228   :  { %v637_v41 = vadd.f32 %v635_v40, %v627_v39 }
0x122a   :  { %1812 = vtanh.f32 %v637_v41  ;;  %v704_v63 = vrot.slane %v637_v41, 6 }
0x1237   :  { %v1813_v42 = vpop.eup %1812 }
0x1238   :  { %640 = vrot.lane.b32.xlu0 %v1813_v42, %s1974_s9 }
0x12aa   :  { %v641_v43 = vpop.permute.xlu0 %640 }
0x12ab   :  { %v643_v44 = vmul.f32 %v1811_v35, %v641_v43 }
0x12ad   :  { %v644_v45 = vpack.c.bf16 %v643_v44, %v643_v44 }
0x12af   :  { %v646_v46 = vrot.slane %v644_v45, 2  ;;  %v726_v47 = vrot.slane %v644_v45, 4 }
0x12b1   :  { %647 = vrot.lane.b32.xlu1 %v646_v46, %s1979_s19  ;;  %v747_v48 = vsel %vm745_vm8, %v744_v24, %v726_v47 }
0x1323   :  { %v648_v49 = vpop.permute.xlu1 %647 }
0x1324   :  { %1663 = vmatmul.mubr.msk.bf16.vlgmr.msra.gmra.mxu1 %vm178_vm2, %v648_v49 }
0x1325   :  { %1678 = vmatprep.mubr.msk.bf16.mxu1 %vm1978_vm0, %v1977_v0  ;;  %1675 = vmatpush3.bf16.msra.mxu1 %v2174_v31 }
0x1326   :  { %1676 = vmatprep.subr.bf16.mxu1 %v1977_v0 }
0x1329   :  { %1677 = vmatpush3.bf16.msra.mxu1 %v2177_v5 }
0x132a   :  { %1690 = vmatprep.subr.bf16.mxu1 %v1977_v0 }
0x13e4   :  { %v686_v50 = vpop.f32.mrf.mxu1 }
0x13e5   :  { %v693_v51 = vrot.slane %v686_v50, 2 }
0x13e6   :  { %v1664_v52 = vpop.f32.mrf.mxu1 }
0x13e7   :  { %v695_v53 = vadd.f32 %v693_v51, %v2053_v8 }
0x13e8   :  { %v689_v54 = vpop.f32.mrf.mxu1 }
0x13e9   :  { %1814 = vtanh.f32 %v695_v53  ;;  %v1527_v57 = vmul.f32 -1.442695, %v695_v53 }
0x13ea   :  { %v1665_v55 = vpop.f32.mrf.mxu1 }
0x13eb   :  { %1816 = vpow2.f32 %v1527_v57 }
0x13f6   :  { %v1815_v56 = vpop.eup %1814 }
0x13f7   :  { %708 = vrot.lane.b32.xlu0 %v1815_v56, %s1974_s9 }
0x13f8   :  { %v1817_v58 = vpop.eup %1816 }
0x13f9   :  { %v699_v59 = vadd.f32 1.0, %v1817_v58 }
0x13fb   :  { %1818 = vrcp.f32 %v699_v59 }
0x1408   :  { %v1819_v60 = vpop.eup %1818 }
0x1409   :  { %v706_v1 = vmul.f32 %v1819_v60, %v704_v63 }
0x1469   :  { %v709_v61 = vpop.permute.xlu0 %708 }
0x146a   :  { %v711_v62 = vmul.f32 %v1819_v60, %v709_v61 }
0x146c   :  { %713 = vrot.lane.b32.xlu1 %v711_v62, %s1979_s19 }
0x14de   :  { %v714_v2 = vpop.permute.xlu1 %713 }
0x14df   :  { %v716_v8 = vadd.f32 %v714_v2, %v706_v1 }
0x14e1   :  { %1820 = vtanh.f32 %v716_v8 }
0x14ee   :  { %v1821_v6 = vpop.eup %1820 }
0x14ef   :  { %719 = vrot.lane.b32.xlu0 %v1821_v6, %s1974_s9 }
0x1561   :  { %v720_v20 = vpop.permute.xlu0 %719 }
0x1562   :  { %v722_v7 = vmul.f32 %v1819_v60, %v720_v20 }
0x1564   :  { %v723_v9 = vpack.c.bf16 %v722_v7, %v722_v7 }
0x1566   :  { %v728_v10 = vrot.slane %v723_v9, 4 }
0x1568   :  { %v750_v21 = vsel %vm748_vm9, %v747_v48, %v728_v10 }
0x1569   :  { %769 = vrot.lane.b32.xlu1 %v750_v21, %s1979_s19 }
0x15db   :  { %v770_v11 = vpop.permute.xlu1 %769 }
0x15dc   :  { %1671 = vmatmul.mubr.msk.bf16.vlgmr.msra.gmra.mxu0 %vm178_vm2, %v770_v11 }
0x15dd   :  { %1686 = vmatprep.mubr.msk.bf16.mxu0 %vm1978_vm0, %v1977_v0  ;;  %1683 = vmatpush3.bf16.msra.mxu0 %v2174_v31 }
0x15de   :  { %1684 = vmatprep.subr.bf16.mxu0 %v1977_v0 }
0x15e1   :  { %1685 = vmatpush3.bf16.msra.mxu0 %v2177_v5 }
0x15e2   :  { %1698 = vmatprep.subr.bf16.mxu0 %v1977_v0 }
0x169c   :  { %v820_v13 = vpop.f32.mrf.mxu0 }
0x169d   :  { %v2166_v14 = vadd.f32 %v1529_v12, %v820_v13 }
0x169e   :  { %v1672_v15 = vpop.f32.mrf.mxu0 }
0x169f   :  { %1822 = vtanh.f32 %v2166_v14  ;;  %v1533_v22 = vmul.f32 -1.442695, %v2166_v14 }
0x16a0   :  { %v823_v16 = vpop.f32.mrf.mxu0 }
0x16a1   :  { %v2169_v17 = vadd.f32 %v1529_v12, %v823_v16  ;;  %1824 = vpow2.f32 %v1533_v22 }
0x16a2   :  { %v1673_v18 = vpop.f32.mrf.mxu0 }
0x16ac   :  { %v1823_v19 = vpop.eup %1822 }
0x16ad   :  { %836 = vrot.lane.b32.xlu0 %v1823_v19, %s1974_s9 }
0x16ae   :  { %v1825_v23 = vpop.eup %1824 }
0x16af   :  { %v830_v24 = vadd.f32 1.0, %v1825_v23 }
0x16b1   :  { %1826 = vrcp.f32 %v830_v24 }
0x16be   :  { %v1827_v25 = vpop.eup %1826 }
0x16bf   :  { %v834_v28 = vmul.f32 0.0, %v1827_v25 }
0x171f   :  { %v837_v26 = vpop.permute.xlu0 %836 }
0x1720   :  { %v839_v27 = vmul.f32 %v1827_v25, %v837_v26 }
0x1722   :  { %841 = vrot.lane.b32.xlu1 %v839_v27, %s1979_s19 }
0x1794   :  { %v842_v29 = vpop.permute.xlu1 %841 }
0x1795   :  { %v844_v30 = vadd.f32 %v842_v29, %v834_v28 }
0x1797   :  { %1828 = vtanh.f32 %v844_v30  ;;  %v922_v50 = vrot.slane %v844_v30, 6 }
0x17a4   :  { %v1829_v32 = vpop.eup %1828 }
0x17a5   :  { %847 = vrot.lane.b32.xlu0 %v1829_v32, %s1974_s9 }
0x1817   :  { %v848_v33 = vpop.permute.xlu0 %847 }
0x1818   :  { %v850_v34 = vmul.f32 %v1827_v25, %v848_v33 }
0x181a   :  { %v851_v35 = vpack.c.bf16 %v850_v34, %v850_v34 }
0x181c   :  { %853 = vrot.lane.b32.xlu1 %v851_v35, %s1979_s19 }
0x188e   :  { %v854_v36 = vpop.permute.xlu1 %853 }
0x188f   :  { %1679 = vmatmul.mubr.msk.bf16.vlgmr.msra.gmra.mxu1 %vm178_vm2, %v854_v36 }
0x1890   :  { %1691 = vmatpush3.bf16.msra.mxu1 %v2174_v31  ;;  %1694 = vmatprep.mubr.msk.bf16.mxu1 %vm1978_vm0, %v1977_v0 }
0x1891   :  { %1692 = vmatprep.subr.bf16.mxu1 %v1977_v0 }
0x1894   :  { %1693 = vmatpush3.bf16.msra.mxu1 %v2177_v5 }
0x1895   :  { %1706 = vmatprep.subr.bf16.mxu1 %v1977_v0 }
0x194f   :  { %v904_v37 = vpop.f32.mrf.mxu1 }
0x1950   :  { %v911_v38 = vrot.slane %v904_v37, 6 }
0x1951   :  { %v1680_v39 = vpop.f32.mrf.mxu1 }
0x1952   :  { %v913_v40 = vadd.f32 %v911_v38, %v2166_v14 }
0x1953   :  { %v907_v41 = vpop.f32.mrf.mxu1 }
0x1954   :  { %1830 = vtanh.f32 %v913_v40  ;;  %v1537_v44 = vmul.f32 -1.442695, %v913_v40 }
0x1955   :  { %v1681_v42 = vpop.f32.mrf.mxu1 }
0x1956   :  { %1832 = vpow2.f32 %v1537_v44 }
0x1961   :  { %v1831_v43 = vpop.eup %1830 }
0x1962   :  { %926 = vrot.lane.b32.xlu0 %v1831_v43, %s1974_s9 }
0x1963   :  { %v1833_v45 = vpop.eup %1832 }
0x1964   :  { %v917_v46 = vadd.f32 1.0, %v1833_v45 }
0x1966   :  { %1834 = vrcp.f32 %v917_v46 }
0x1973   :  { %v1835_v47 = vpop.eup %1834 }
0x1974   :  { %v924_v51 = vmul.f32 %v1835_v47, %v922_v50 }
0x19d4   :  { %v927_v48 = vpop.permute.xlu0 %926 }
0x19d5   :  { %v929_v49 = vmul.f32 %v1835_v47, %v927_v48 }
0x19d7   :  { %931 = vrot.lane.b32.xlu1 %v929_v49, %s1979_s19 }
0x1a49   :  { %v932_v52 = vpop.permute.xlu1 %931 }
0x1a4a   :  { %v934_v53 = vadd.f32 %v932_v52, %v924_v51 }
0x1a4c   :  { %1836 = vtanh.f32 %v934_v53  ;;  %v1001_v10 = vrot.slane %v934_v53, 6 }
0x1a59   :  { %v1837_v54 = vpop.eup %1836 }
0x1a5a   :  { %937 = vrot.lane.b32.xlu0 %v1837_v54, %s1974_s9 }
0x1acc   :  { %v938_v55 = vpop.permute.xlu0 %937 }
0x1acd   :  { %v940_v56 = vmul.f32 %v1835_v47, %v938_v55 }
0x1acf   :  { %v941_v57 = vpack.c.bf16 %v940_v56, %v940_v56 }
0x1ad1   :  { %v943_v58 = vrot.slane %v941_v57, 1 }
0x1ad3   :  { %944 = vrot.lane.b32.xlu1 %v943_v58, %s1979_s19 }
0x1b45   :  { %v945_v59 = vpop.permute.xlu1 %944 }
0x1b46   :  { %1687 = vmatmul.mubr.msk.bf16.vlgmr.msra.gmra.mxu0 %vm178_vm2, %v945_v59 }
0x1b47   :  { %1699 = vmatpush3.bf16.msra.mxu0 %v2174_v31  ;;  %1702 = vmatprep.mubr.msk.bf16.mxu0 %vm1978_vm0, %v1977_v0 }
0x1b48   :  { %1700 = vmatprep.subr.bf16.mxu0 %v1977_v0 }
0x1b4b   :  { %1701 = vmatpush3.bf16.msra.mxu0 %v2177_v5 }
0x1b4c   :  { %1714 = vmatprep.subr.bf16.mxu0 %v1977_v0 }
0x1c06   :  { %v983_v60 = vpop.f32.mrf.mxu0 }
0x1c07   :  { %v990_v61 = vrot.slane %v983_v60, 4 }
0x1c08   :  { %v1688_v62 = vpop.f32.mrf.mxu0 }
0x1c09   :  { %v992_v63 = vadd.f32 %v990_v61, %v2166_v14 }
0x1c0a   :  { %v986_v1 = vpop.f32.mrf.mxu0 }
0x1c0b   :  { %1838 = vtanh.f32 %v992_v63  ;;  %v1539_v3 = vmul.f32 -1.442695, %v992_v63 }
0x1c0c   :  { %v1689_v2 = vpop.f32.mrf.mxu0 }
0x1c0d   :  { %1840 = vpow2.f32 %v1539_v3 }
0x1c18   :  { %v1839_v8 = vpop.eup %1838 }
0x1c19   :  { %1005 = vrot.lane.b32.xlu0 %v1839_v8, %s1974_s9 }
0x1c1a   :  { %v1841_v4 = vpop.eup %1840 }
0x1c1b   :  { %v996_v6 = vadd.f32 1.0, %v1841_v4 }
0x1c1d   :  { %1842 = vrcp.f32 %v996_v6 }
0x1c2a   :  { %v1843_v20 = vpop.eup %1842 }
0x1c2b   :  { %v1003_v21 = vmul.f32 %v1843_v20, %v1001_v10 }
0x1c8b   :  { %v1006_v7 = vpop.permute.xlu0 %1005 }
0x1c8c   :  { %v1008_v9 = vmul.f32 %v1843_v20, %v1006_v7 }
0x1c8e   :  { %1010 = vrot.lane.b32.xlu1 %v1008_v9, %s1979_s19 }
0x1d00   :  { %v1011_v11 = vpop.permute.xlu1 %1010 }
0x1d01   :  { %v1013_v12 = vadd.f32 %v1011_v11, %v1003_v21 }
0x1d03   :  { %1844 = vtanh.f32 %v1013_v12  ;;  %v1080_v37 = vrot.slane %v1013_v12, 6 }
0x1d10   :  { %v1845_v13 = vpop.eup %1844 }
0x1d11   :  { %1016 = vrot.lane.b32.xlu0 %v1845_v13, %s1974_s9 }
0x1d83   :  { %v1017_v15 = vpop.permute.xlu0 %1016 }
0x1d84   :  { %v1019_v16 = vmul.f32 %v1843_v20, %v1017_v15 }
0x1d86   :  { %v1020_v18 = vpack.c.bf16 %v1019_v16, %v1019_v16 }
0x1d88   :  { %v1022_v19 = vrot.slane %v1020_v18, 2 }
0x1d8a   :  { %1023 = vrot.lane.b32.xlu1 %v1022_v19, %s1979_s19 }
0x1dfc   :  { %v1024_v22 = vpop.permute.xlu1 %1023 }
0x1dfd   :  { %1695 = vmatmul.mubr.msk.bf16.vlgmr.msra.gmra.mxu1 %vm178_vm2, %v1024_v22 }
0x1dfe   :  { %1707 = vmatpush3.bf16.msra.mxu1 %v2174_v31  ;;  %1710 = vmatprep.mubr.msk.bf16.mxu1 %vm1978_vm0, %v1977_v0 }
0x1dff   :  { %1708 = vmatprep.subr.bf16.mxu1 %v1977_v0 }
0x1e02   :  { %1709 = vmatpush3.bf16.msra.mxu1 %v2177_v5 }
0x1e03   :  { %1722 = vmatprep.subr.bf16.mxu1 %v1977_v0 }
0x1ebd   :  { %v1062_v23 = vpop.f32.mrf.mxu1 }
0x1ebe   :  { %v1069_v24 = vrot.slane %v1062_v23, 2 }
0x1ebf   :  { %v1696_v25 = vpop.f32.mrf.mxu1 }
0x1ec0   :  { %v1071_v26 = vadd.f32 %v1069_v24, %v2166_v14 }
0x1ec1   :  { %v1065_v27 = vpop.f32.mrf.mxu1 }
0x1ec2   :  { %1846 = vtanh.f32 %v1071_v26  ;;  %v1541_v30 = vmul.f32 -1.442695, %v1071_v26 }
0x1ec3   :  { %v1697_v28 = vpop.f32.mrf.mxu1 }
0x1ec4   :  { %1848 = vpow2.f32 %v1541_v30 }
0x1ecf   :  { %v1847_v29 = vpop.eup %1846 }
0x1ed0   :  { %1084 = vrot.lane.b32.xlu0 %v1847_v29, %s1974_s9 }
0x1ed1   :  { %v1849_v32 = vpop.eup %1848 }
0x1ed2   :  { %v1075_v33 = vadd.f32 1.0, %v1849_v32 }
0x1ed4   :  { %1850 = vrcp.f32 %v1075_v33 }
0x1ee1   :  { %v1851_v34 = vpop.eup %1850 }
0x1ee2   :  { %v1082_v38 = vmul.f32 %v1851_v34, %v1080_v37 }
0x1f42   :  { %v1085_v35 = vpop.permute.xlu0 %1084 }
0x1f43   :  { %v1087_v36 = vmul.f32 %v1851_v34, %v1085_v35 }
0x1f45   :  { %1089 = vrot.lane.b32.xlu1 %v1087_v36, %s1979_s19 }
0x1fb7   :  { %v1090_v39 = vpop.permute.xlu1 %1089 }
0x1fb8   :  { %v1092_v14 = vadd.f32 %v1090_v39, %v1082_v38 }
0x1fba   :  { %1852 = vtanh.f32 %v1092_v14  ;;  %v1156_v58 = vrot.slane %v1092_v14, 6 }
0x1fc7   :  { %v1853_v40 = vpop.eup %1852 }
0x1fc8   :  { %1095 = vrot.lane.b32.xlu0 %v1853_v40, %s1974_s9 }
0x203a   :  { %v1096_v41 = vpop.permute.xlu0 %1095 }
0x203b   :  { %v1098_v42 = vmul.f32 %v1851_v34, %v1096_v41 }
0x203d   :  { %v1099_v43 = vpack.c.bf16 %v1098_v42, %v1098_v42 }
0x203f   :  { %v1101_v44 = vrot.slane %v1099_v43, 3 }
0x2041   :  { %1102 = vrot.lane.b32.xlu1 %v1101_v44, %s1979_s19 }
0x20b3   :  { %v1103_v45 = vpop.permute.xlu1 %1102 }
0x20b4   :  { %1703 = vmatmul.mubr.msk.bf16.vlgmr.msra.gmra.mxu0 %vm178_vm2, %v1103_v45 }
0x20b5   :  { %1715 = vmatpush3.bf16.msra.mxu0 %v2174_v31  ;;  %1718 = vmatprep.mubr.msk.bf16.mxu0 %vm1978_vm0, %v1977_v0 }
0x20b6   :  { %1716 = vmatprep.subr.bf16.mxu0 %v1977_v0 }
0x20b9   :  { %1717 = vmatpush3.bf16.msra.mxu0 %v2177_v5 }
0x20ba   :  { %1730 = vmatprep.subr.bf16.mxu0 %v1977_v0 }
0x2174   :  { %v1141_v46 = vpop.f32.mrf.mxu0 }
0x2175   :  { %v1147_v47 = vadd.f32 %v1141_v46, %v2169_v17 }
0x2176   :  { %v1704_v48 = vpop.f32.mrf.mxu0 }
0x2177   :  { %1854 = vtanh.f32 %v1147_v47  ;;  %v1543_v52 = vmul.f32 -1.442695, %v1147_v47 }
0x2178   :  { %v1144_v49 = vpop.f32.mrf.mxu0 }
0x2179   :  { %1856 = vpow2.f32 %v1543_v52 }
0x217a   :  { %v1705_v50 = vpop.f32.mrf.mxu0 }
0x2184   :  { %v1855_v51 = vpop.eup %1854 }
0x2185   :  { %1160 = vrot.lane.b32.xlu0 %v1855_v51, %s1974_s9 }
0x2186   :  { %v1857_v53 = vpop.eup %1856 }
0x2187   :  { %v1151_v54 = vadd.f32 1.0, %v1857_v53 }
0x2189   :  { %1858 = vrcp.f32 %v1151_v54 }
0x2196   :  { %v1859_v55 = vpop.eup %1858 }
0x2197   :  { %v1158_v59 = vmul.f32 %v1859_v55, %v1156_v58 }
0x21f7   :  { %v1161_v56 = vpop.permute.xlu0 %1160 }
0x21f8   :  { %v1163_v57 = vmul.f32 %v1859_v55, %v1161_v56 }
0x21fa   :  { %1165 = vrot.lane.b32.xlu1 %v1163_v57, %s1979_s19 }
0x226c   :  { %v1166_v60 = vpop.permute.xlu1 %1165 }
0x226d   :  { %v1168_v61 = vadd.f32 %v1166_v60, %v1158_v59 }
0x226f   :  { %1860 = vtanh.f32 %v1168_v61 }
0x227c   :  { %v1861_v62 = vpop.eup %1860 }
0x227d   :  { %1171 = vrot.lane.b32.xlu0 %v1861_v62, %s1974_s9 }
0x22ef   :  { %v1172_v63 = vpop.permute.xlu0 %1171 }
0x22f0   :  { %v1174_v1 = vmul.f32 %v1859_v55, %v1172_v63 }
0x22f2   :  { %v1175_v2 = vpack.c.bf16 %v1174_v1, %v1174_v1  ;;  %v1411_v1 = vld [vmem:[#allocation5] sm:$0x3] }
0x22f4   :  { %1177 = vrot.lane.b32.xlu1 %v1175_v2, %s1979_s19  ;;  %v1413_v2 = vrot.slane %v1411_v1, 2 }
0x2366   :  { %v1178_v8 = vpop.permute.xlu1 %1177 }
0x2367   :  { %1711 = vmatmul.mubr.msk.bf16.vlgmr.msra.gmra.mxu1 %vm178_vm2, %v1178_v8 }
0x2368   :  { %1723 = vmatpush3.bf16.msra.mxu1 %v2174_v31  ;;  %1726 = vmatprep.mubr.msk.bf16.mxu1 %vm1978_vm0, %v1977_v0 }
0x2369   :  { %1724 = vmatprep.subr.bf16.mxu1 %v1977_v0 }
0x236c   :  { %1725 = vmatpush3.bf16.msra.mxu1 %v2177_v5  ;;  %v1234_v5 = vrot.slane %v1168_v61, 6 }
0x2427   :  { %v1216_v3 = vpop.f32.mrf.mxu1 }
0x2428   :  { %v1223_v4 = vrot.slane %v1216_v3, 6 }
0x2429   :  { %v1712_v6 = vpop.f32.mrf.mxu1 }
0x242a   :  { %v1225_v20 = vadd.f32 %v1223_v4, %v2169_v17  ;;  %v1756_v6 = vld [vmem:[%s2277_s2 + $0x8] sm:$0xff]  }
0x242b   :  { %v1219_v7 = vpop.f32.mrf.mxu1 }
0x242c   :  { %1862 = vtanh.f32 %v1225_v20  ;;  %v1545_v21 = vmul.f32 -1.442695, %v1225_v20  ;;  %v1757_v20 = vld [vmem:[%s2277_s2] sm:$0xff]   ;;  %s1981_s2 = smov [#allocation8]  }
0x242d   :  { %v1713_v9 = vpop.f32.mrf.mxu1  ;;  %s1497_s8 = sshll.u32 %s1981_s2, 4  ;;  %s1498_s8 = int_to_ptr.vmem [resolvable:$true] %s1497_s8 }
0x242e   :  { %1864 = vpow2.f32 %v1545_v21  ;;  %p1951_p2 = scmp.lt.s32.totalorder %s1498_s8, %s1498_s8 }
0x2439   :  { %v1863_v10 = vpop.eup %1862 }
0x243a   :  { %1238 = vrot.lane.b32.xlu0 %v1863_v10, %s1974_s9 }
0x243b   :  { %v1865_v31 = vpop.eup %1864 }
0x243c   :  { %v1229_v11 = vadd.f32 1.0, %v1865_v31 }
0x243e   :  { %1866 = vrcp.f32 %v1229_v11 }
0x244b   :  { %v1867_v12 = vpop.eup %1866 }
0x244c   :  { %v1236_v16 = vmul.f32 %v1867_v12, %v1234_v5 }
0x24ac   :  { %v1239_v13 = vpop.permute.xlu0 %1238 }
0x24ad   :  { %v1241_v15 = vmul.f32 %v1867_v12, %v1239_v13 }
0x24af   :  { %1243 = vrot.lane.b32.xlu1 %v1241_v15, %s1979_s19  ;;  %v1550_v15 = vld [vmem:[%s2278_s3] ss:$0 sm:$0xff] }
0x2521   :  { %v1244_v18 = vpop.permute.xlu1 %1243 }
0x2522   :  { %v1246_v19 = vadd.f32 %v1244_v18, %v1236_v16 }
0x2524   :  { %1868 = vtanh.f32 %v1246_v19  ;;  %v1313_v41 = vrot.slane %v1246_v19, 6 }
0x2531   :  { %v1869_v22 = vpop.eup %1868 }
0x2532   :  { %1249 = vrot.lane.b32.xlu0 %v1869_v22, %s1974_s9 }
0x25a4   :  { %v1250_v23 = vpop.permute.xlu0 %1249 }
0x25a5   :  { %v1252_v24 = vmul.f32 %v1867_v12, %v1250_v23 }
0x25a7   :  { %v1253_v25 = vpack.c.bf16 %v1252_v24, %v1252_v24 }
0x25a9   :  { %v1255_v26 = vrot.slane %v1253_v25, 1 }
0x25ab   :  { %1256 = vrot.lane.b32.xlu1 %v1255_v26, %s1979_s19 }
0x261d   :  { %v1257_v27 = vpop.permute.xlu1 %1256 }
0x261e   :  { %1719 = vmatmul.mubr.msk.bf16.vlgmr.msra.gmra.mxu0 %vm178_vm2, %v1257_v27 }
0x261f   :  { %1734 = vmatprep.mubr.msk.bf16.mxu0 %vm1978_vm0, %v1977_v0  ;;  %1731 = vmatpush3.bf16.msra.mxu0 %v1756_v6 }
0x2620   :  { %1732 = vmatprep.subr.bf16.mxu0 %v1977_v0 }
0x2623   :  { %1733 = vmatpush3.bf16.msra.mxu0 %v1757_v20 }
0x26de   :  { %v1295_v28 = vpop.f32.mrf.mxu0 }
0x26df   :  { %v1302_v29 = vrot.slane %v1295_v28, 4 }
0x26e0   :  { %v1720_v30 = vpop.f32.mrf.mxu0 }
0x26e1   :  { %v1304_v32 = vadd.f32 %v1302_v29, %v2169_v17 }
0x26e2   :  { %v1298_v33 = vpop.f32.mrf.mxu0 }
0x26e3   :  { %1870 = vtanh.f32 %v1304_v32  ;;  %v1547_v36 = vmul.f32 -1.442695, %v1304_v32 }
0x26e4   :  { %v1721_v34 = vpop.f32.mrf.mxu0 }
0x26e5   :  { %1872 = vpow2.f32 %v1547_v36 }
0x26f0   :  { %v1871_v35 = vpop.eup %1870 }
0x26f1   :  { %1317 = vrot.lane.b32.xlu0 %v1871_v35, %s1974_s9 }
0x26f2   :  { %v1873_v37 = vpop.eup %1872 }
0x26f3   :  { %v1308_v38 = vadd.f32 1.0, %v1873_v37 }
0x26f5   :  { %1874 = vrcp.f32 %v1308_v38 }
0x2702   :  { %v1875_v39 = vpop.eup %1874 }
0x2703   :  { %v1315_v42 = vmul.f32 %v1875_v39, %v1313_v41 }
0x2763   :  { %v1318_v14 = vpop.permute.xlu0 %1317 }
0x2764   :  { %v1320_v40 = vmul.f32 %v1875_v39, %v1318_v14 }
0x2766   :  { %1322 = vrot.lane.b32.xlu1 %v1320_v40, %s1979_s19 }
0x27d8   :  { %v1323_v43 = vpop.permute.xlu1 %1322 }
0x27d9   :  { %v1325_v44 = vadd.f32 %v1323_v43, %v1315_v42 }
0x27db   :  { %1876 = vtanh.f32 %v1325_v44 }
0x27e8   :  { %v1877_v45 = vpop.eup %1876 }
0x27e9   :  { %1328 = vrot.lane.b32.xlu0 %v1877_v45, %s1974_s9 }
0x285b   :  { %v1329_v46 = vpop.permute.xlu0 %1328 }
0x285c   :  { %v1331_v47 = vmul.f32 %v1875_v39, %v1329_v46 }
0x285e   :  { %v1332_v48 = vpack.c.bf16 %v1331_v47, %v1331_v47 }
0x2860   :  { %v1334_v49 = vrot.slane %v1332_v48, 2 }
0x2862   :  { %1335 = vrot.lane.b32.xlu1 %v1334_v49, %s1979_s19 }
0x28d4   :  { %v1336_v50 = vpop.permute.xlu1 %1335 }
0x28d5   :  { %1727 = vmatmul.mubr.msk.bf16.vlgmr.msra.gmra.mxu1 %vm178_vm2, %v1336_v50 }
0x2995   :  { %v1374_v51 = vpop.f32.mrf.mxu1 }
0x2996   :  { %v1381_v52 = vrot.slane %v1374_v51, 2 }
0x2997   :  { %v1728_v53 = vpop.f32.mrf.mxu1 }
0x2998   :  { %v1383_v54 = vadd.f32 %v1381_v52, %v2169_v17  ;;  %v1392_v17 = vrot.slane %v1325_v44, 6 }
0x2999   :  { %v1377_v55 = vpop.f32.mrf.mxu1 }
0x299a   :  { %1878 = vtanh.f32 %v1383_v54  ;;  %v1549_v58 = vmul.f32 -1.442695, %v1383_v54 }
0x299b   :  { %v1729_v56 = vpop.f32.mrf.mxu1 }
0x299c   :  { %1880 = vpow2.f32 %v1549_v58 }
0x29a7   :  { %v1879_v57 = vpop.eup %1878 }
0x29a8   :  { %1396 = vrot.lane.b32.xlu0 %v1879_v57, %s1974_s9 }
0x29a9   :  { %v1881_v59 = vpop.eup %1880 }
0x29aa   :  { %v1387_v60 = vadd.f32 1.0, %v1881_v59 }
0x29ac   :  { %1882 = vrcp.f32 %v1387_v60 }
0x29b9   :  { %v1883_v61 = vpop.eup %1882 }
0x29ba   :  { %v1394_v8 = vmul.f32 %v1883_v61, %v1392_v17 }
0x2a1a   :  { %v1397_v62 = vpop.permute.xlu0 %1396 }
0x2a1b   :  { %v1399_v63 = vmul.f32 %v1883_v61, %v1397_v62 }
0x2a1d   :  { %1401 = vrot.lane.b32.xlu1 %v1399_v63, %s1979_s19 }
0x2a21   :  { %1414 = vrot.lane.b32.xlu1 %v1413_v2, %s1980_s6 }
0x2a8f   :  { %v1402_v3 = vpop.permute.xlu1 %1401 }
0x2a90   :  { %v1404_v4 = vadd.f32 %v1402_v3, %v1394_v8 }
0x2a92   :  { %1884 = vtanh.f32 %v1404_v4 }
0x2a93   :  { %v1415_v10 = vpop.permute.xlu1 %1414 }
0x2a9f   :  { %v1885_v7 = vpop.eup %1884 }
0x2aa0   :  { %1407 = vrot.lane.b32.xlu0 %v1885_v7, %s1974_s9  ;;  %s1946_s9 = scalar_lea.vmem %s1498_s8, 32 }
0x2aa1   :  { %p1947_p1 = scmp.ne.s32.totalorder %s1498_s8, %s1946_s9  ;;  %p1952_p3 = scmp.lt.s32.totalorder %s1946_s9, %s1946_s9 }
0x2aa3   :  { %p1953_p4 = por %p1952_p3, %p1951_p2 }
0x2aa5   :  { %p1954_p5 = pnand %p1953_p4, %p1947_p1 }
0x2b12   :  { %v1408_v9 = vpop.permute.xlu0 %1407 }
0x2b13   :  { %v1410_v21 = vmul.f32 %v1883_v61, %v1408_v9 }
0x2b15   :  { %v1417_v31 = vadd.f32 %v1415_v10, %v1410_v21 }
0x2b17   :  { %v1418_v11 = vpack.c.bf16 %v1417_v31, %v1417_v31 }
0x2b19   :  { %v1431_v12 = vrot.slane %v1418_v11, 3 }
0x2b1b   :  { %1432 = vrot.lane.b32.xlu0 %v1431_v12, %s1979_s19 }
0x2b8d   :  { %v1433_v13 = vpop.permute.xlu0 %1432 }
0x2b8e   :  { %1735 = vmatmul.mubr.msk.bf16.vlgmr.msra.gmra.mxu0 %vm178_vm2, %v1433_v13 }
0x2c4e   :  { %v1483_v0 = vpop.f32.mrf.mxu0 }
0x2c4f   :  { %v1484_v5 = vadd.f32 %v1550_v15, %v1483_v0 }
0x2c50   :  { %v1736_v16 = vpop.f32.mrf.mxu0 }
0x2c51   :  { %1490 = vst.msk [vmem:[#allocation8] sm:$0x3] %vm1489_vm10, %v1484_v5 }
0x2c52   :  { %v1486_v18 = vpop.f32.mrf.mxu0 }
0x2c53   :  { %1957 = shalt.err (!%p1954_p5)
}
0x2c54   :  { %1500 = dma.vmem_to_hbm [thread:$0]  %s1498_s8, 32, %s2282_s7, [#allocation4]   ;;  %v1737_v19 = vpop.f32.mrf.mxu0 }
0x2c55   :  { %1970 = dma.done.wait [#allocation4], 32  }
0x2c56   :  { %1971 = vsyncadd [#allocation4], 4294967264 }
0x2c57   :  { %1504 = vsyncpa [#allocation3], 1 }
0x2c58   :  { %1505 = vsyncpa [#allocation6], 1 }
0x2c59   :  { %1506 = vsyncpa [#allocation4], 1 }

</bundles_post_ra>
